<compile_context>
chip_gen: v7x
topology: tpu7x:2x2x1
jax: 0.10.0
libtpu: 0.0.40
codegen_flags: <defaults>
</compile_context>

<pallas_src>
import functools

import jax
import jax.numpy as jnp
from jax.experimental import pallas as pl
from jax.experimental.pallas import tpu as pltpu

BN_EPS = 1e-4
LANE = 128


def _conv_bn_relu_kernel(x_ref, w_ref, b_ref, o_ref, *, is_relu):
  # x_ref: (1, Hp, Wp, C)      padded NHWC sample (bf16), resident across h/k steps
  # w_ref: (KH*KW, C, TN)      conv weights with BN scale folded in (bf16)
  # b_ref: (1, TN)             folded BN bias (f32)
  # o_ref: (1, TH, W, TN)      output tile (f32)
  _, th, w_out, tn = o_ref.shape
  c = x_ref.shape[-1]
  h0 = pl.program_id(1) * th  # first output row of this tile (== padded row for kh=0)

  acc = jnp.zeros((th * w_out, tn), jnp.float32)
  for kh in range(3):
    xs = x_ref[0, pl.ds(h0 + kh, th), :, :]            # (TH, Wp, C)
    for kw in range(3):
      xt = xs[:, kw:kw + w_out, :].reshape(th * w_out, c)
      acc = acc + jnp.dot(xt, w_ref[kh * 3 + kw],
                          preferred_element_type=jnp.float32)

  acc = acc + b_ref[...]                                # (1, TN) broadcast
  if is_relu:
    acc = jnp.maximum(acc, 0.0)
  o_ref[0] = acc.reshape(th, w_out, tn).astype(o_ref.dtype)


def conv_bn_relu_2d(x_nchw, weight_oihw, gamma, beta, running_mean,
                    running_var, *, is_bn=True, is_relu=True,
                    compute_dtype=jnp.bfloat16):
  """Forward pass of ConvBnRelu2d (kernel_size=3, padding=1, stride=1)."""
  N, C, H, W = x_nchw.shape
  K, Cin, KH, KW = weight_oihw.shape
  assert Cin == C and KH == 3 and KW == 3
  pad = 1
  Hp, Wp = H + 2 * pad, W + 2 * pad

  # ---- BN (eval mode) folded: scale into weights, bias kept for epilogue ----
  if is_bn:
    scale = (gamma.astype(jnp.float32) /
             jnp.sqrt(running_var.astype(jnp.float32) + BN_EPS))
    bias = beta.astype(jnp.float32) - running_mean.astype(jnp.float32) * scale
  else:
    scale = jnp.ones((K,), jnp.float32)
    bias = jnp.zeros((K,), jnp.float32)

  # ---- weights OIHW -> (KH*KW, Cin, Cout), scale folded, Cout lane-padded ----
  Kp = ((K + LANE - 1) // LANE) * LANE
  TN = LANE
  w = jnp.transpose(weight_oihw.astype(jnp.float32), (2, 3, 1, 0))   # (KH,KW,C,K)
  w = w * scale[None, None, None, :]
  w = w.reshape(KH * KW, C, K)
  w = jnp.pad(w, ((0, 0), (0, 0), (0, Kp - K))).astype(compute_dtype)
  bias_p = jnp.pad(bias, (0, Kp - K)).reshape(1, Kp).astype(jnp.float32)

  # ---- glue: NCHW -> NHWC (bf16) + zero pad; im2col happens in-kernel ----
  x = jnp.transpose(x_nchw, (0, 2, 3, 1)).astype(compute_dtype)      # (N,H,W,C)
  x_pad = jnp.pad(x, ((0, 0), (pad, pad), (pad, pad), (0, 0)))       # (N,Hp,Wp,C)

  # ---- row-tile: ~1024 output pixels per tile, TH must divide H ----
  th = max(1, min(H, -(-1024 // W)))
  while H % th:
    th -= 1

  grid = (N, H // th, Kp // TN)

  itemsize = jnp.dtype(compute_dtype).itemsize
  x_blk = Hp * Wp * C * itemsize
  w_blk = KH * KW * C * TN * itemsize
  b_blk = TN * 4
  o_blk = th * W * TN * 4
  vmem_bytes = 2 * (x_blk + w_blk + b_blk + o_blk) + (1 << 20)
  flops = 2 * N * H * W * KH * KW * C * Kp
  bytes_accessed = (N * Hp * Wp * C * itemsize + KH * KW * C * Kp * itemsize +
                    Kp * 4 + N * H * W * Kp * 4)

  out = pl.pallas_call(
      functools.partial(_conv_bn_relu_kernel, is_relu=is_relu),
      out_shape=jax.ShapeDtypeStruct((N, H, W, Kp), jnp.float32),
      grid=grid,
      in_specs=[
          # whole padded sample; block index only depends on n -> fetched once
          # per sample and reused across all h / Cout tiles.
          pl.BlockSpec((1, Hp, Wp, C), lambda n, h, k: (n, 0, 0, 0)),
          pl.BlockSpec((KH * KW, C, TN), lambda n, h, k: (0, 0, k)),
          pl.BlockSpec((1, TN), lambda n, h, k: (0, k)),
      ],
      out_specs=pl.BlockSpec((1, th, W, TN), lambda n, h, k: (n, h, 0, k)),
      compiler_params=pltpu.CompilerParams(
          dimension_semantics=("parallel", "parallel", "parallel"),
          vmem_limit_bytes=int(max(vmem_bytes, 32 * 1024 * 1024))),
      cost_estimate=pl.CostEstimate(flops=flops, transcendentals=0,
                                    bytes_accessed=bytes_accessed),
  )(x_pad, w, bias_p)

  # ---- glue: drop Cout padding, back to NCHW (module interface) ----
  out = out[..., :K]
  return jnp.transpose(out, (0, 3, 1, 2))


def _reference(x_nchw, weight_oihw, gamma, beta, running_mean, running_var):
  y = jax.lax.conv_general_dilated(
      x_nchw, weight_oihw, window_strides=(1, 1),
      padding=((1, 1), (1, 1)),
      dimension_numbers=("NCHW", "OIHW", "NCHW"),
      precision=jax.lax.Precision.HIGHEST)
  scale = gamma / jnp.sqrt(running_var + BN_EPS)
  bias = beta - running_mean * scale
  y = y * scale[None, :, None, None] + bias[None, :, None, None]
  return jnp.maximum(y, 0.0)


if __name__ == "__main__":
  N, C, K, H, W = 2, 4, 8, 16, 16

  key = jax.random.PRNGKey(0)
  kx, kw, kg, kb, km, kv = jax.random.split(key, 6)
  x = jax.random.normal(kx, (N, C, H, W), jnp.float32)
  weight = jax.random.normal(kw, (K, C, 3, 3), jnp.float32) * 0.1
  gamma = jax.random.uniform(kg, (K,), jnp.float32, 0.5, 1.5)
  beta = jax.random.normal(kb, (K,), jnp.float32) * 0.1
  running_mean = jax.random.normal(km, (K,), jnp.float32) * 0.1
  running_var = jnp.abs(jax.random.normal(kv, (K,), jnp.float32)) + 0.5

  out = conv_bn_relu_2d(x, weight, gamma, beta, running_mean, running_var)
  out = jax.block_until_ready(out)

  ref = _reference(x, weight, gamma, beta, running_mean, running_var)
  assert out.shape == (N, K, H, W)
  # bf16 operands (f32 accumulation) -> bf16-appropriate tolerance vs f32 ref.
  max_err = float(jnp.max(jnp.abs(out - ref)))
  assert jnp.allclose(out, ref, rtol=1e-2, atol=3e-2), max_err

  print("KERNEL_OK")
</pallas_src>

<mosaic_0001>
module attributes {stable_mosaic.version = 11 : i64} {
  func.func @_conv_bn_relu_kernel(%arg0: i32, %arg1: i32, %arg2: i32, %arg3: memref<1x18x18x4xbf16, #tpu.memory_space<vmem>>, %arg4: memref<9x4x128xbf16, #tpu.memory_space<vmem>>, %arg5: memref<1x128xf32, #tpu.memory_space<vmem>>, %arg6: memref<1x16x16x128xf32, #tpu.memory_space<vmem>>) attributes {dimension_semantics = [#tpu.dimension_semantics<parallel>, #tpu.dimension_semantics<parallel>, #tpu.dimension_semantics<parallel>], iteration_bounds = array<i64: 2, 1, 1>, scalar_prefetch = 0 : i64, scratch_operands = 0 : i64, tpu.core_type = #tpu.core_type<tc>, window_params = [{transform_indices = @transform_0, window_bounds = array<i64: 1, 18, 18, 4>}, {transform_indices = @transform_1, window_bounds = array<i64: 9, 4, 128>}, {transform_indices = @transform_2, window_bounds = array<i64: 1, 128>}, {transform_indices = @transform_3, window_bounds = array<i64: 1, 16, 16, 128>}]} {
    %c16_i32 = arith.constant 16 : i32
    %0 = arith.muli %arg1, %c16_i32 : i32
    %cst = arith.constant 0.000000e+00 : f32
    %1 = vector.broadcast %cst : f32 to vector<256x128xf32>
    %c0_i32 = arith.constant 0 : i32
    %2 = arith.addi %0, %c0_i32 : i32
    %c0 = arith.constant 0 : index
    %3 = arith.index_cast %2 : i32 to index
    %c0_0 = arith.constant 0 : index
    %c0_1 = arith.constant 0 : index
    %4 = vector.load %arg3[%c0, %3, %c0_0, %c0_1] : memref<1x18x18x4xbf16, #tpu.memory_space<vmem>>, vector<1x16x18x4xbf16>
    %5 = vector.shape_cast %4 : vector<1x16x18x4xbf16> to vector<16x18x4xbf16>
    %6 = vector.extract_strided_slice %5 {offsets = [0, 0, 0], sizes = [16, 16, 4], strides = [1, 1, 1]} : vector<16x18x4xbf16> to vector<16x16x4xbf16>
    %7 = vector.shape_cast %6 : vector<16x16x4xbf16> to vector<256x4xbf16>
    %c0_2 = arith.constant 0 : index
    %c0_3 = arith.constant 0 : index
    %c0_4 = arith.constant 0 : index
    %8 = vector.load %arg4[%c0_2, %c0_3, %c0_4] : memref<9x4x128xbf16, #tpu.memory_space<vmem>>, vector<1x4x128xbf16>
    %9 = vector.shape_cast %8 : vector<1x4x128xbf16> to vector<4x128xbf16>
    %cst_5 = arith.constant dense<0.000000e+00> : vector<256x128xf32>
    %10 = tpu.matmul %7, %9, %cst_5 {dimension_numbers = #tpu.dot_dimension_numbers<[1], [0], [0], [1], [0, 0, 1, 1], [], []>} : vector<256x4xbf16>, vector<4x128xbf16>, vector<256x128xf32> -> vector<256x128xf32>
    %11 = arith.addf %1, %10 : vector<256x128xf32>
    %12 = vector.extract_strided_slice %5 {offsets = [0, 1, 0], sizes = [16, 16, 4], strides = [1, 1, 1]} : vector<16x18x4xbf16> to vector<16x16x4xbf16>
    %13 = vector.shape_cast %12 : vector<16x16x4xbf16> to vector<256x4xbf16>
    %c1 = arith.constant 1 : index
    %c0_6 = arith.constant 0 : index
    %c0_7 = arith.constant 0 : index
    %14 = vector.load %arg4[%c1, %c0_6, %c0_7] : memref<9x4x128xbf16, #tpu.memory_space<vmem>>, vector<1x4x128xbf16>
    %15 = vector.shape_cast %14 : vector<1x4x128xbf16> to vector<4x128xbf16>
    %cst_8 = arith.constant dense<0.000000e+00> : vector<256x128xf32>
    %16 = tpu.matmul %13, %15, %cst_8 {dimension_numbers = #tpu.dot_dimension_numbers<[1], [0], [0], [1], [0, 0, 1, 1], [], []>} : vector<256x4xbf16>, vector<4x128xbf16>, vector<256x128xf32> -> vector<256x128xf32>
    %17 = arith.addf %11, %16 : vector<256x128xf32>
    %18 = vector.extract_strided_slice %5 {offsets = [0, 2, 0], sizes = [16, 16, 4], strides = [1, 1, 1]} : vector<16x18x4xbf16> to vector<16x16x4xbf16>
    %19 = vector.shape_cast %18 : vector<16x16x4xbf16> to vector<256x4xbf16>
    %c2 = arith.constant 2 : index
    %c0_9 = arith.constant 0 : index
    %c0_10 = arith.constant 0 : index
    %20 = vector.load %arg4[%c2, %c0_9, %c0_10] : memref<9x4x128xbf16, #tpu.memory_space<vmem>>, vector<1x4x128xbf16>
    %21 = vector.shape_cast %20 : vector<1x4x128xbf16> to vector<4x128xbf16>
    %cst_11 = arith.constant dense<0.000000e+00> : vector<256x128xf32>
    %22 = tpu.matmul %19, %21, %cst_11 {dimension_numbers = #tpu.dot_dimension_numbers<[1], [0], [0], [1], [0, 0, 1, 1], [], []>} : vector<256x4xbf16>, vector<4x128xbf16>, vector<256x128xf32> -> vector<256x128xf32>
    %23 = arith.addf %17, %22 : vector<256x128xf32>
    %c1_i32 = arith.constant 1 : i32
    %24 = arith.addi %0, %c1_i32 : i32
    %c0_12 = arith.constant 0 : index
    %25 = arith.index_cast %24 : i32 to index
    %c0_13 = arith.constant 0 : index
    %c0_14 = arith.constant 0 : index
    %26 = vector.load %arg3[%c0_12, %25, %c0_13, %c0_14] : memref<1x18x18x4xbf16, #tpu.memory_space<vmem>>, vector<1x16x18x4xbf16>
    %27 = vector.shape_cast %26 : vector<1x16x18x4xbf16> to vector<16x18x4xbf16>
    %28 = vector.extract_strided_slice %27 {offsets = [0, 0, 0], sizes = [16, 16, 4], strides = [1, 1, 1]} : vector<16x18x4xbf16> to vector<16x16x4xbf16>
    %29 = vector.shape_cast %28 : vector<16x16x4xbf16> to vector<256x4xbf16>
    %c3 = arith.constant 3 : index
    %c0_15 = arith.constant 0 : index
    %c0_16 = arith.constant 0 : index
    %30 = vector.load %arg4[%c3, %c0_15, %c0_16] : memref<9x4x128xbf16, #tpu.memory_space<vmem>>, vector<1x4x128xbf16>
    %31 = vector.shape_cast %30 : vector<1x4x128xbf16> to vector<4x128xbf16>
    %cst_17 = arith.constant dense<0.000000e+00> : vector<256x128xf32>
    %32 = tpu.matmul %29, %31, %cst_17 {dimension_numbers = #tpu.dot_dimension_numbers<[1], [0], [0], [1], [0, 0, 1, 1], [], []>} : vector<256x4xbf16>, vector<4x128xbf16>, vector<256x128xf32> -> vector<256x128xf32>
    %33 = arith.addf %23, %32 : vector<256x128xf32>
    %34 = vector.extract_strided_slice %27 {offsets = [0, 1, 0], sizes = [16, 16, 4], strides = [1, 1, 1]} : vector<16x18x4xbf16> to vector<16x16x4xbf16>
    %35 = vector.shape_cast %34 : vector<16x16x4xbf16> to vector<256x4xbf16>
    %c4 = arith.constant 4 : index
    %c0_18 = arith.constant 0 : index
    %c0_19 = arith.constant 0 : index
    %36 = vector.load %arg4[%c4, %c0_18, %c0_19] : memref<9x4x128xbf16, #tpu.memory_space<vmem>>, vector<1x4x128xbf16>
    %37 = vector.shape_cast %36 : vector<1x4x128xbf16> to vector<4x128xbf16>
    %cst_20 = arith.constant dense<0.000000e+00> : vector<256x128xf32>
    %38 = tpu.matmul %35, %37, %cst_20 {dimension_numbers = #tpu.dot_dimension_numbers<[1], [0], [0], [1], [0, 0, 1, 1], [], []>} : vector<256x4xbf16>, vector<4x128xbf16>, vector<256x128xf32> -> vector<256x128xf32>
    %39 = arith.addf %33, %38 : vector<256x128xf32>
    %40 = vector.extract_strided_slice %27 {offsets = [0, 2, 0], sizes = [16, 16, 4], strides = [1, 1, 1]} : vector<16x18x4xbf16> to vector<16x16x4xbf16>
    %41 = vector.shape_cast %40 : vector<16x16x4xbf16> to vector<256x4xbf16>
    %c5 = arith.constant 5 : index
    %c0_21 = arith.constant 0 : index
    %c0_22 = arith.constant 0 : index
    %42 = vector.load %arg4[%c5, %c0_21, %c0_22] : memref<9x4x128xbf16, #tpu.memory_space<vmem>>, vector<1x4x128xbf16>
    %43 = vector.shape_cast %42 : vector<1x4x128xbf16> to vector<4x128xbf16>
    %cst_23 = arith.constant dense<0.000000e+00> : vector<256x128xf32>
    %44 = tpu.matmul %41, %43, %cst_23 {dimension_numbers = #tpu.dot_dimension_numbers<[1], [0], [0], [1], [0, 0, 1, 1], [], []>} : vector<256x4xbf16>, vector<4x128xbf16>, vector<256x128xf32> -> vector<256x128xf32>
    %45 = arith.addf %39, %44 : vector<256x128xf32>
    %c2_i32 = arith.constant 2 : i32
    %46 = arith.addi %0, %c2_i32 : i32
    %c0_24 = arith.constant 0 : index
    %47 = arith.index_cast %46 : i32 to index
    %c0_25 = arith.constant 0 : index
    %c0_26 = arith.constant 0 : index
    %48 = vector.load %arg3[%c0_24, %47, %c0_25, %c0_26] : memref<1x18x18x4xbf16, #tpu.memory_space<vmem>>, vector<1x16x18x4xbf16>
    %49 = vector.shape_cast %48 : vector<1x16x18x4xbf16> to vector<16x18x4xbf16>
    %50 = vector.extract_strided_slice %49 {offsets = [0, 0, 0], sizes = [16, 16, 4], strides = [1, 1, 1]} : vector<16x18x4xbf16> to vector<16x16x4xbf16>
    %51 = vector.shape_cast %50 : vector<16x16x4xbf16> to vector<256x4xbf16>
    %c6 = arith.constant 6 : index
    %c0_27 = arith.constant 0 : index
    %c0_28 = arith.constant 0 : index
    %52 = vector.load %arg4[%c6, %c0_27, %c0_28] : memref<9x4x128xbf16, #tpu.memory_space<vmem>>, vector<1x4x128xbf16>
    %53 = vector.shape_cast %52 : vector<1x4x128xbf16> to vector<4x128xbf16>
    %cst_29 = arith.constant dense<0.000000e+00> : vector<256x128xf32>
    %54 = tpu.matmul %51, %53, %cst_29 {dimension_numbers = #tpu.dot_dimension_numbers<[1], [0], [0], [1], [0, 0, 1, 1], [], []>} : vector<256x4xbf16>, vector<4x128xbf16>, vector<256x128xf32> -> vector<256x128xf32>
    %55 = arith.addf %45, %54 : vector<256x128xf32>
    %56 = vector.extract_strided_slice %49 {offsets = [0, 1, 0], sizes = [16, 16, 4], strides = [1, 1, 1]} : vector<16x18x4xbf16> to vector<16x16x4xbf16>
    %57 = vector.shape_cast %56 : vector<16x16x4xbf16> to vector<256x4xbf16>
    %c7 = arith.constant 7 : index
    %c0_30 = arith.constant 0 : index
    %c0_31 = arith.constant 0 : index
    %58 = vector.load %arg4[%c7, %c0_30, %c0_31] : memref<9x4x128xbf16, #tpu.memory_space<vmem>>, vector<1x4x128xbf16>
    %59 = vector.shape_cast %58 : vector<1x4x128xbf16> to vector<4x128xbf16>
    %cst_32 = arith.constant dense<0.000000e+00> : vector<256x128xf32>
    %60 = tpu.matmul %57, %59, %cst_32 {dimension_numbers = #tpu.dot_dimension_numbers<[1], [0], [0], [1], [0, 0, 1, 1], [], []>} : vector<256x4xbf16>, vector<4x128xbf16>, vector<256x128xf32> -> vector<256x128xf32>
    %61 = arith.addf %55, %60 : vector<256x128xf32>
    %62 = vector.extract_strided_slice %49 {offsets = [0, 2, 0], sizes = [16, 16, 4], strides = [1, 1, 1]} : vector<16x18x4xbf16> to vector<16x16x4xbf16>
    %63 = vector.shape_cast %62 : vector<16x16x4xbf16> to vector<256x4xbf16>
    %c8 = arith.constant 8 : index
    %c0_33 = arith.constant 0 : index
    %c0_34 = arith.constant 0 : index
    %64 = vector.load %arg4[%c8, %c0_33, %c0_34] : memref<9x4x128xbf16, #tpu.memory_space<vmem>>, vector<1x4x128xbf16>
    %65 = vector.shape_cast %64 : vector<1x4x128xbf16> to vector<4x128xbf16>
    %cst_35 = arith.constant dense<0.000000e+00> : vector<256x128xf32>
    %66 = tpu.matmul %63, %65, %cst_35 {dimension_numbers = #tpu.dot_dimension_numbers<[1], [0], [0], [1], [0, 0, 1, 1], [], []>} : vector<256x4xbf16>, vector<4x128xbf16>, vector<256x128xf32> -> vector<256x128xf32>
    %67 = arith.addf %61, %66 : vector<256x128xf32>
    %c0_36 = arith.constant 0 : index
    %c0_37 = arith.constant 0 : index
    %68 = vector.load %arg5[%c0_36, %c0_37] : memref<1x128xf32, #tpu.memory_space<vmem>>, vector<1x128xf32>
    %69 = vector.broadcast %68 : vector<1x128xf32> to vector<256x128xf32>
    %70 = arith.addf %67, %69 : vector<256x128xf32>
    %cst_38 = arith.constant 0.000000e+00 : f32
    %71 = vector.broadcast %cst_38 : f32 to vector<256x128xf32>
    %72 = arith.maximumf %70, %71 : vector<256x128xf32>
    %73 = vector.shape_cast %72 : vector<256x128xf32> to vector<16x16x128xf32>
    %c0_39 = arith.constant 0 : index
    %c0_40 = arith.constant 0 : index
    %c0_41 = arith.constant 0 : index
    %c0_42 = arith.constant 0 : index
    %74 = vector.load %arg6[%c0_39, %c0_40, %c0_41, %c0_42] : memref<1x16x16x128xf32, #tpu.memory_space<vmem>>, vector<1x16x16x128xf32>
    %75 = vector.shape_cast %74 : vector<1x16x16x128xf32> to vector<16x16x128xf32>
    %76 = vector.shape_cast %73 : vector<16x16x128xf32> to vector<1x16x16x128xf32>
    tpu.vector_store %arg6[%c0_39, %c0_40, %c0_41, %c0_42], %76 {strides = array<i32>} : memref<1x16x16x128xf32, #tpu.memory_space<vmem>>, vector<1x16x16x128xf32>,
    return
  }
  func.func @transform_0(%arg0: i32, %arg1: i32, %arg2: i32) -> (i32, i32, i32, i32) {
    %c0_i32 = arith.constant 0 : i32
    %c0_i32_0 = arith.constant 0 : i32
    %c0_i32_1 = arith.constant 0 : i32
    %c0_i32_2 = arith.constant 0 : i32
    return %arg0, %c0_i32, %c0_i32_0, %c0_i32_1 : i32, i32, i32, i32
  }
  func.func @transform_1(%arg0: i32, %arg1: i32, %arg2: i32) -> (i32, i32, i32) {
    %c0_i32 = arith.constant 0 : i32
    %c0_i32_0 = arith.constant 0 : i32
    %c0_i32_1 = arith.constant 0 : i32
    return %c0_i32, %c0_i32_0, %arg2 : i32, i32, i32
  }
  func.func @transform_2(%arg0: i32, %arg1: i32, %arg2: i32) -> (i32, i32) {
    %c0_i32 = arith.constant 0 : i32
    %c0_i32_0 = arith.constant 0 : i32
    return %c0_i32, %arg2 : i32, i32
  }
  func.func @transform_3(%arg0: i32, %arg1: i32, %arg2: i32) -> (i32, i32, i32, i32) {
    %c0_i32 = arith.constant 0 : i32
    %c0_i32_0 = arith.constant 0 : i32
    return %arg0, %arg1, %c0_i32, %arg2 : i32, i32, i32, i32
  }
}

</mosaic_0001>

<bundles_post_ra>
// kernel: tpu_custom_call.1
= control target key start
LH: loop header
LB: loop body
LE: loop exit
PB: predicated region body
PF: predicated region fallthrough
CT: control target
= control target key end

     0   :  { %8 = vsyncpa [#allocation3], 0  ;;  %s8496_s0 = inlined_call_operand.vmem [shape: bf16[2,18,18,4], index: 0, kind: input, shape index: {}]   ;;  %s8497_s1 = inlined_call_operand.vmem [shape: bf16[9,4,128], index: 1, kind: input, shape index: {}]   ;;  %s8498_s2 = inlined_call_operand.vmem [shape: f32[1,128], index: 2, kind: input, shape index: {}]   ;;  %s8499_s3 = inlined_call_operand.hbm [shape: f32[2,16,16,128], index: 3, kind: output, shape index: {}]  }
   0x1   :  { %10 = vsyncpa [#allocation3 + $0x1], 0  ;;  %s6341_s12 = smov 0   ;;  %s6343_s13 = smov 0  }
   0x2   :  { %s6345_s14 = smov 0   ;;  %s6347_s15 = smov 0  }
   0x3   :  { %s6349_s16 = smov 0   ;;  %s6351_s17 = smov 0  }
   0x4 LB: > { %s4837_s18 = sadd.s32 4294967295, %s6316_s17   ;;  %s4838_s19 = sadd.s32 4294967294, %s6316_s17   ;;  %s6316_s17 = sphi %s6351_s17, %s16_s17   ;;  %s6312_s16 = sphi %s6349_s16, %s8618_s16   ;;  %s6308_s15 = sphi %s6347_s15, %s8617_s15   ;;  %s6304_s14 = sphi %s6345_s14, %s8616_s14   ;;  %s6300_s13 = sphi %s6343_s13, %s8615_s13   ;;  %s6296_s12 = sphi %s6341_s12, %s8614_s12  }
   0x5   : > { %s35_s20 = sadd.s32 1, %s6312_s16  ;;  %s124_s21 = sadd.s32 1, %s6304_s14 }
   0x6   : > { %p37_p0 = scmp.ge.s32.totalorder %s35_s20, 2  ;;  %p134_p1 = scmp.ne.s32.totalorder %s6304_s14, %s6300_s13 }
   0x7   : > { %p135_p2 = scmp.eq.s32.totalorder %s4837_s18, 1  ;;  %p140_p3 = scmp.ne.s32.totalorder %s6300_s13, %s6296_s12 }
   0x8   : > { %s8620_s20 = smov (%p37_p0, %s35_s20), 0  ;;  %p141_p5 = scmp.eq.s32.totalorder %s4838_s19, 1 }
   0x9   : > { %p6381_p4 = por %p135_p2, %p134_p1  ;;  %s117_s23 = ssub.s32 %s6312_s16, %s8620_s20 }
   0xa   : > { %p4843_p6 = scmp.ge.s32.totalorder %s6316_s17, 1  ;;  %p122_p7 = scmp.eq.s32.totalorder %s117_s23, 0 }
   0xb   : > { %p6388_p8 = por %p141_p5, %p140_p3  ;;  %p180_p9 = scmp.lt.s32.totalorder %s6316_s17, 3 }
   0xc   : > { %s6394_s25 = scalar_select %p122_p7, %s6304_s14, %s124_s21  }
   0xd   : > { %p181_p10 = pnand %p4843_p6, %p180_p9 }
   0xf   : > { %184 = sbr.rel (%p181_p10) target bundleno = 615 (0x267), region = 32 }
  0x16   : > { %v4846_v0 = vld [vmem:[%s8497_s1 + $0x2] sm:$0x3]  ;;  %vm764_vm0 = vcmask 1041408   ;;  %v5041_v1 = vld [vmem:[%s8497_s1 + $0x8] sm:$0x3]  ;;  %p211_p11 = scmp.lt.s32.totalorder %s6308_s15, 1 }
  0x17   : > { %6010 = vmatprep.subr.msk.bf16.mxu1 %vm764_vm0, %v4846_v0  ;;  %6014 = vmatprep.subr.msk.bf16.mxu0 %vm764_vm0, %v5041_v1  ;;  %v766_v2 = vsel %vm764_vm0, %v4846_v0, 0  ;;  %v6407_v3 = vsel %vm764_vm0, %v5041_v1, 0  ;;  %v277_v4 = vld [vmem:[%s8497_s1] sm:$0x3]  ;;  %v5090_v5 = vld [vmem:[%s8497_s1 + $0xa] sm:$0x3] }
  0x18   : > { %8524 = vst [vmem:[#allocation5_spill] sm:$0xff] %v6407_v3  ;;  %5447 = vmatpush3.bf16.msra.mxu1 %v766_v2  ;;  %5583 = vmatpush3.bf16.msra.mxu0 %v6407_v3  ;;  %s212_s30 = scalar_select %p211_p11, %s6308_s15, 1  ;;  %vm278_vm1 = vsmask.f32 3328  ;;  %vm279_vm2 = vsmask.f32 7440 }
  0x19   : > { %6011 = vmatprep.subr.msk.bf16.mxu1 %vm764_vm0, %v277_v4  ;;  %6016 = vmatprep.subr.msk.bf16.mxu0 %vm764_vm0, %v5090_v5  ;;  %vm715_vm3 = vcmask 31744   ;;  %v6437_v17 = vsel %vm764_vm0, %v277_v4, 0  ;;  %vm6448_vm4 = vmor %vm278_vm1, %vm279_vm2  ;;  %v6453_v36 = vsel %vm764_vm0, %v5090_v5, 0  ;;  %v6463_v50 = vld [vmem:[%s8497_s1 + $0xc] sm:$0x3]  ;;  %vm1237_vm5 = vcmask 1042432  }
  0x1a   : > { %s6020_s8 = smul.u32 216, %s212_s30  ;;  %v6480_v1 = vsel %vm764_vm0, %v6463_v50, 0  ;;  %vm1238_vm6 = vcmask 1046532   ;;  %s208_s9 = sand.u32 1, %s6300_s13  }
  0x1b   : > { %vm6714_vm7 = vmor %vm1237_vm5, %vm1238_vm6  ;;  %s4844_s18 = sshll.u32 %s208_s9, 8  ;;  %s5292_s21 = sshll.u32 %s6308_s15, 12 }
  0x1c   : > { %s6422_s11 = scalar_lea.vmem %s8496_s0, %s6020_s8  ;;  %s8373_s19 = scalar_lea.vmem [#allocation2], %s4844_s18 }
  0x1d   : > { %v229_v6 = vld [vmem:[%s6422_s11] sm:$0xf]  ;;  %v230_v7 = vld [vmem:[%s6422_s11 + $0x4] sm:$0xf]  ;;  %v231_v8 = vld [vmem:[%s6422_s11 + $0x8] sm:$0x1]  ;;  %s8441_s28 = scalar_lea.hbm %s8499_s3, %s5292_s21 }
  0x1e   : > { %v282_v9 = vshrl.u32 %v229_v6, 16  ;;  %v285_v10 = vshll.u32 %v229_v6, 16  ;;  %v291_v11 = vshll.u32 %v230_v7, 16  ;;  %v295_v12 = vshrl.u32 %v230_v7, 16  ;;  %v6428_v13 = vld [vmem:[%s6422_s11 + $0xc] sm:$0xf] }
  0x1f   : > { %v301_v14 = vshll.u32 %v231_v8, 16  ;;  %v6431_v15 = vld [vmem:[%s6422_s11 + $0x10] sm:$0xf]  ;;  %v6434_v16 = vld [vmem:[%s6422_s11 + $0x14] sm:$0x1]  ;;  %v2025_v23 = vshrl.u32 %v6428_v13, 16 }
  0x20   : > { %v284_v18 = vrot.slane %v282_v9, 4  ;;  %v287_v19 = vrot.slane %v285_v10, 5  ;;  %v293_v20 = vrot.slane %v291_v11, 5  ;;  %v297_v21 = vrot.slane %v295_v12, 4  ;;  %v232_v30 = vld [vmem:[%s6422_s11 + $0xc] sm:$0xf] }
  0x21   : > { %v303_v22 = vrot.slane %v301_v14, 5  ;;  %v2028_v24 = vshll.u32 %v6428_v13, 16  ;;  %v2034_v25 = vshll.u32 %v6431_v15, 16  ;;  %v2038_v28 = vshrl.u32 %v6431_v15, 16  ;;  %v233_v31 = vld [vmem:[%s6422_s11 + $0x10] sm:$0xf] }
  0x22   : > { %v288_v26 = vor.u32 %v287_v19, %v284_v18  ;;  %v298_v27 = vor.u32 %v297_v21, %v293_v20  ;;  %v2044_v29 = vshll.u32 %v6434_v16, 16  ;;  %v2027_v33 = vrot.slane %v2025_v23, 4  ;;  %v234_v42 = vld [vmem:[%s6422_s11 + $0x14] sm:$0x1]  ;;  %v6466_v55 = vld [vmem:[%s6422_s11 + $0x18] sm:$0xf] }
  0x23   : > { %v2030_v34 = vrot.slane %v2028_v24, 5  ;;  %v2036_v35 = vrot.slane %v2034_v25, 5  ;;  %v2040_v39 = vrot.slane %v2038_v28, 4  ;;  %v306_v43 = vshrl.u32 %v232_v30, 16  ;;  %v6469_v60 = vld [vmem:[%s6422_s11 + $0x1c] sm:$0xf] }
  0x24   : > { %v289_v37 = vrot.slane %v288_v26, 4  ;;  %v299_v38 = vrot.slane %v298_v27, 4  ;;  %v2046_v40 = vrot.slane %v2044_v29, 5  ;;  %v309_v44 = vshll.u32 %v232_v30, 16  ;;  %v6476_v0 = vld [vmem:[%s6422_s11 + $0x20] sm:$0x1] }
  0x25   : > { %v2031_v41 = vor.u32 %v2030_v34, %v2027_v33  ;;  %v315_v45 = vshll.u32 %v233_v31, 16  ;;  %v2041_v48 = vor.u32 %v2040_v39, %v2036_v35  ;;  %v319_v49 = vshrl.u32 %v233_v31, 16  ;;  %v235_v11 = vld [vmem:[%s6422_s11 + $0x18] sm:$0xf]  ;;  %v237_v25 = vld [vmem:[%s6422_s11 + $0x20] sm:$0x1] }
  0x26   : > { %v294_v46 = vsel %vm6448_vm4, %v289_v37, %v293_v20  ;;  %v304_v47 = vsel %vm6448_vm4, %v299_v38, %v303_v22  ;;  %v308_v53 = vrot.slane %v306_v43, 4  ;;  %v311_v54 = vrot.slane %v309_v44, 5  ;;  %v236_v20 = vld [vmem:[%s6422_s11 + $0x1c] sm:$0xf]  ;;  %v6500_v30 = vld [vmem:[%s6422_s11 + $0x24] sm:$0xf] }
  0x27   : > { %v4847_v51 = vcombine.low %v294_v46, %v304_v47  ;;  %v2032_v52 = vrot.slane %v2031_v41, 4  ;;  %v2042_v56 = vrot.slane %v2041_v48, 4  ;;  %v317_v57 = vrot.slane %v315_v45, 5  ;;  %v4927_v41 = vld [vmem:[%s8497_s1 + $0x4] sm:$0x3]  ;;  %s4723_s23 = sshll.u32 %s8373_s19, 4  ;;  %s8443_s23 = int_to_ptr.vmem [resolvable:$true] %s4723_s23 }
  0x28   : > { %v321_v58 = vrot.slane %v319_v49, 4  ;;  %v325_v59 = vshll.u32 %v234_v42, 16  ;;  %v2723_v62 = vrot.slane %v6434_v16, 5  ;;  %v312_v63 = vor.u32 %v311_v54, %v308_v53  ;;  %v6507_v45 = vld [vmem:[%s6422_s11 + $0x28] sm:$0xf]  ;;  %s8450_s15 = scalar_lea.sflag [#allocation3], %s208_s9 }
  0x29   : > { %5448 = vmatprep.mubr.msk.bf16.mxu1 %vm715_vm3, %v4847_v51  ;;  %v2037_v61 = vsel %vm6448_vm4, %v2032_v52, %v2036_v35  ;;  %v2047_v2 = vsel %vm6448_vm4, %v2042_v56, %v2046_v40  ;;  %v2049_v6 = vshrl.u32 %v6466_v55, 16  ;;  %v2052_v9 = vshll.u32 %v6466_v55, 16  ;;  %v6512_v52 = vld [vmem:[%s6422_s11 + $0x2c] sm:$0x1]  ;;  %v7296_v3 = vld [vmem:[%s6422_s11 + $0xb8] sm:$0xf] }
  0x2a   : > { %v322_v4 = vor.u32 %v321_v58, %v317_v57  ;;  %v327_v5 = vrot.slane %v325_v59, 5  ;;  %v5042_v7 = vcombine.low %v2037_v61, %v2047_v2  ;;  %v313_v8 = vrot.slane %v312_v63, 4  ;;  %v238_v58 = vld [vmem:[%s6422_s11 + $0x24] sm:$0xf]  ;;  %s6238_s29 = scalar_lea.vmem %s8443_s23, 4096  ;;  %s6318_s30 = smov [#allocation2]  }
  0x2b   : > { %v2058_v10 = vshll.u32 %v6469_v60, 16  ;;  %v2051_v14 = vrot.slane %v2049_v6, 4  ;;  %v2062_v18 = vshrl.u32 %v6469_v60, 16  ;;  %v2068_v19 = vshll.u32 %v6476_v0, 16  ;;  %p6239_p12 = scmp.ne.s32.totalorder %s8443_s23, %s6238_s29  ;;  %s6242_s4 = sshll.u32 %s6318_s30, 4  ;;  %s6243_s4 = int_to_ptr.vmem [resolvable:$false] %s6242_s4 }
  0x2c   : > { %v323_v12 = vrot.slane %v322_v4, 4  ;;  %5584 = vmatprep.mubr.msk.bf16.mxu0 %vm715_vm3, %v5042_v7  ;;  %v318_v21 = vsel %vm6448_vm4, %v313_v8, %v317_v57  ;;  %v2054_v22 = vrot.slane %v2052_v9, 5  ;;  %v2727_v24 = vrot.slane %v6469_v60, 5  ;;  %v239_v7 = vld [vmem:[%s6422_s11 + $0x28] sm:$0xf]  ;;  %s6244_s5 = scalar_lea.vmem %s6243_s4, 8192  ;;  %p6245_p1 = scmp.lt.s32.totalorder %s8443_s23, %s6243_s4 }
  0x2d   : > { %v2060_v23 = vrot.slane %v2058_v10, 5  ;;  %v2064_v27 = vrot.slane %v2062_v18, 4  ;;  %v2070_v28 = vrot.slane %v2068_v19, 5  ;;  %v2730_v29 = vrot.slane %v6476_v0, 5  ;;  %v240_v19 = vld [vmem:[%s6422_s11 + $0x2c] sm:$0x1]  ;;  %p6240_p13 = pnand %p6239_p12, %p6381_p4  ;;  %p6246_p2 = scmp.lt.s32.totalorder %s6244_s5, %s6238_s29 }
  0x2e   : > { %v328_v26 = vsel %vm6448_vm4, %v323_v12, %v327_v5  ;;  %v2055_v33 = vor.u32 %v2054_v22, %v2051_v14  ;;  %v330_v34 = vshrl.u32 %v235_v11, 16  ;;  %v333_v35 = vshll.u32 %v235_v11, 16 }
  0x2f   : > { %v4848_v31 = vcombine.low %v318_v21, %v328_v26  ;;  %v2065_v37 = vor.u32 %v2064_v27, %v2060_v23  ;;  %v339_v38 = vshll.u32 %v236_v20, 16  ;;  %v343_v39 = vshrl.u32 %v236_v20, 16  ;;  %v6530_v21 = vld [vmem:[%s6422_s11 + $0x30] sm:$0xf]  ;;  %p6241_p0 = pneg %p6240_p13  ;;  %p6247_p3 = por %p6246_p2, %p6245_p1 }
  0x30   : > { %v349_v40 = vshll.u32 %v237_v25, 16  ;;  %v2056_v42 = vrot.slane %v2055_v33, 4  ;;  %v332_v43 = vrot.slane %v330_v34, 4  ;;  %v335_v44 = vrot.slane %v333_v35, 5  ;;  %v6536_v34 = vld [vmem:[%s6422_s11 + $0x34] sm:$0xf] }
  0x31   : > { %5449 = vmatmul.mubr.msk.bf16.vlgmr.msra.gmra.mrb[0].mxu1 %vm715_vm3, %v4848_v31  ;;  %v2073_v46 = vshrl.u32 %v6500_v30, 16  ;;  %v2066_v47 = vrot.slane %v2065_v37, 4  ;;  %v341_v48 = vrot.slane %v339_v38, 5  ;;  %v345_v49 = vrot.slane %v343_v39, 4  ;;  %p6248_p5 = pnand %p6247_p3, %p6241_p0 }
  0x32   : > { %5481 = vmatpush3.bf16.msra.mxu1 %v6437_v17  ;;  %v351_v51 = vrot.slane %v349_v40, 5  ;;  %v2061_v53 = vsel %vm6448_vm4, %v2056_v42, %v2060_v23  ;;  %v336_v54 = vor.u32 %v335_v44, %v332_v43  ;;  %v2076_v57 = vshll.u32 %v6500_v30, 16  ;;  %v6545_v42 = vld [vmem:[%s6422_s11 + $0x38] sm:$0x1]  ;;  %v6549_v44 = vld [vmem:[%s6422_s11 + $0x30] sm:$0xf] }
  0x33   : > { %v2075_v56 = vrot.slane %v2073_v46, 4  ;;  %6012 = vmatprep.subr.msk.bf16.mxu1 %vm764_vm0, %v4927_v41  ;;  %v2071_v17 = vsel %vm6448_vm4, %v2066_v47, %v2070_v28  ;;  %v346_v59 = vor.u32 %v345_v49, %v341_v48  ;;  %v2082_v61 = vshll.u32 %v6507_v45, 16 }
  0x34   : > { %v2086_v63 = vshrl.u32 %v6507_v45, 16  ;;  %v5043_v2 = vcombine.low %v2061_v53, %v2071_v17  ;;  %v337_v4 = vrot.slane %v336_v54, 4  ;;  %v2078_v5 = vrot.slane %v2076_v57, 5 }
  0x35   : > { %v2092_v6 = vshll.u32 %v6512_v52, 16  ;;  %v347_v8 = vrot.slane %v346_v59, 4  ;;  %v2084_v9 = vrot.slane %v2082_v61, 5  ;;  %v354_v11 = vshrl.u32 %v238_v58, 16 }
  0x36   : > { %v2088_v10 = vrot.slane %v2086_v63, 4  ;;  %5585 = vmatmul.mubr.msk.bf16.vlgmr.msra.gmra.mrb[0].mxu0 %vm715_vm3, %v5043_v2  ;;  %v342_v12 = vsel %vm6448_vm4, %v337_v4, %v341_v48  ;;  %v2079_v14 = vor.u32 %v2078_v5, %v2075_v56  ;;  %v357_v20 = vshll.u32 %v238_v58, 16  ;;  %v6555_v56 = vld [vmem:[%s6422_s11 + $0x34] sm:$0xf]  ;;  %v243_v4 = vld [vmem:[%s6422_s11 + $0x38] sm:$0x1] }
  0x37   : > { %v2094_v18 = vrot.slane %v2092_v6, 5  ;;  %5617 = vmatpush3.bf16.msra.mxu0 %v6453_v36  ;;  %v352_v22 = vsel %vm6448_vm4, %v347_v8, %v351_v51  ;;  %v356_v25 = vrot.slane %v354_v11, 4  ;;  %v363_v26 = vshll.u32 %v239_v7, 16 }
  0x38   : > { %v2089_v23 = vor.u32 %v2088_v10, %v2084_v9  ;;  %v4849_v27 = vcombine.low %v342_v12, %v352_v22  ;;  %v2080_v28 = vrot.slane %v2079_v14, 4  ;;  %v359_v31 = vrot.slane %v357_v20, 5  ;;  %6017 = vmatprep.subr.msk.bf16.mxu0 %vm764_vm0, %v6463_v50  ;;  %v6567_v10 = vld [vmem:[%s6422_s11 + $0x3c] sm:$0xf] }
  0x39   : > { %v367_v33 = vshrl.u32 %v239_v7, 16  ;;  %v365_v37 = vrot.slane %v363_v26, 5  ;;  %v373_v36 = vshll.u32 %v240_v19, 16  ;;  %v2097_v38 = vshrl.u32 %v6530_v21, 16  ;;  %v6573_v19 = vld [vmem:[%s6422_s11 + $0x40] sm:$0xf] }
  0x3a   : > { %v2090_v35 = vrot.slane %v2089_v23, 4  ;;  %5452 = vmatprep.mubr.msk.bf16.mxu1 %vm715_vm3, %v4849_v27  ;;  %v2085_v39 = vsel %vm6448_vm4, %v2080_v28, %v2084_v9  ;;  %v360_v40 = vor.u32 %v359_v31, %v356_v25  ;;  %v2100_v43 = vshll.u32 %v6530_v21, 16  ;;  %v6578_v31 = vld [vmem:[%s6422_s11 + $0x44] sm:$0x1] }
  0x3b   : > { %v369_v41 = vrot.slane %v367_v33, 4  ;;  %v375_v46 = vrot.slane %v373_v36, 5  ;;  %v2099_v47 = vrot.slane %v2097_v38, 4  ;;  %v2106_v48 = vshll.u32 %v6536_v34, 16 }
  0x3c   : > { %v2095_v50 = vsel %vm6448_vm4, %v2090_v35, %v2094_v18  ;;  %v361_v51 = vrot.slane %v360_v40, 4  ;;  %v2102_v54 = vrot.slane %v2100_v43, 5  ;;  %v2110_v58 = vshrl.u32 %v6536_v34, 16 }
  0x3d   : > { %v5044_v49 = vcombine.low %v2085_v39, %v2095_v50  ;;  %v370_v53 = vor.u32 %v369_v41, %v365_v37  ;;  %v2108_v57 = vrot.slane %v2106_v48, 5  ;;  %v2116_v17 = vshll.u32 %v6545_v42, 16  ;;  %v6586_v50 = vld [vmem:[%s6422_s11 + $0x3c] sm:$0xf] }
  0x3e   : > { %v378_v59 = vshrl.u32 %v6549_v44, 16  ;;  %v366_v61 = vsel %vm6448_vm4, %v361_v51, %v365_v37  ;;  %v2103_v2 = vor.u32 %v2102_v54, %v2099_v47  ;;  %v381_v5 = vshll.u32 %v6549_v44, 16  ;;  %v6592_v51 = vld [vmem:[%s6422_s11 + $0x40] sm:$0xf] }
  0x3f   : > { %5588 = vmatprep.mubr.msk.bf16.mxu0 %vm715_vm3, %v5044_v49  ;;  %v371_v63 = vrot.slane %v370_v53, 4  ;;  %v2112_v6 = vrot.slane %v2110_v58, 4  ;;  %v2118_v7 = vrot.slane %v2116_v17, 5  ;;  %v387_v9 = vshll.u32 %v6555_v56, 16 }
  0x40   : > { %v380_v8 = vrot.slane %v378_v59, 4  ;;  %v2104_v12 = vrot.slane %v2103_v2, 4  ;;  %v383_v14 = vrot.slane %v381_v5, 5  ;;  %v391_v18 = vshrl.u32 %v6555_v56, 16 }
  0x41   : > { %v376_v11 = vsel %vm6448_vm4, %v371_v63, %v375_v46  ;;  %v2113_v22 = vor.u32 %v2112_v6, %v2108_v57  ;;  %v389_v23 = vrot.slane %v387_v9, 5  ;;  %v397_v25 = vshll.u32 %v243_v4, 16 }
  0x42   : > { %v4850_v20 = vcombine.low %v366_v61, %v376_v11  ;;  %v2109_v26 = vsel %vm6448_vm4, %v2104_v12, %v2108_v57  ;;  %v384_v27 = vor.u32 %v383_v14, %v380_v8  ;;  %v393_v28 = vrot.slane %v391_v18, 4  ;;  %v246_v61 = vld [vmem:[%s6422_s11 + $0x44] sm:$0x1]  ;;  %v6605_v8 = vld [vmem:[%s6422_s11 + $0x48] sm:$0xf] }
  0x43   : > { %v2121_v33 = vshrl.u32 %v6567_v10, 16  ;;  %v2114_v35 = vrot.slane %v2113_v22, 4  ;;  %v399_v37 = vrot.slane %v397_v25, 5  ;;  %v2124_v36 = vshll.u32 %v6567_v10, 16  ;;  %v6608_v18 = vld [vmem:[%s6422_s11 + $0x4c] sm:$0xf] }
  0x44   : > { %5453 = vmatmul.mubr.msk.bf16.gmra.mrb[4].mxu1 %vm715_vm3, %v4850_v20  ;;  %v2130_v38 = vshll.u32 %v6573_v19, 16  ;;  %v385_v39 = vrot.slane %v384_v27, 4  ;;  %v394_v40 = vor.u32 %v393_v28, %v389_v23  ;;  %v2134_v43 = vshrl.u32 %v6573_v19, 16  ;;  %v6614_v28 = vld [vmem:[%s6422_s11 + $0x50] sm:$0x1] }
  0x45   : > { %v2123_v41 = vrot.slane %v2121_v33, 4  ;;  %v2119_v46 = vsel %vm6448_vm4, %v2114_v35, %v2118_v7  ;;  %v2126_v47 = vrot.slane %v2124_v36, 5  ;;  %v2140_v49 = vshll.u32 %v6578_v31, 16 }
  0x46   : > { %v2132_v48 = vrot.slane %v2130_v38, 5  ;;  %v5045_v53 = vcombine.low %v2109_v26, %v2119_v46  ;;  %v390_v54 = vsel %vm6448_vm4, %v385_v39, %v389_v23  ;;  %v395_v57 = vrot.slane %v394_v40, 4  ;;  %v6622_v40 = vld [vmem:[%s6422_s11 + $0x48] sm:$0xf] }
  0x47   : > { %v2136_v58 = vrot.slane %v2134_v43, 4  ;;  %v2127_v17 = vor.u32 %v2126_v47, %v2123_v41  ;;  %v2142_v59 = vrot.slane %v2140_v49, 5  ;;  %v402_v63 = vshrl.u32 %v6586_v50, 16 }
  0x48   : > { %v405_v2 = vshll.u32 %v6586_v50, 16  ;;  %5589 = vmatmul.mubr.msk.bf16.gmra.mrb[4].mxu0 %vm715_vm3, %v5045_v53  ;;  %v400_v4 = vsel %vm6448_vm4, %v395_v57, %v399_v37  ;;  %v411_v6 = vshll.u32 %v6592_v51, 16  ;;  %v415_v7 = vshrl.u32 %v6592_v51, 16 }
  0x49   : > { %v2137_v5 = vor.u32 %v2136_v58, %v2132_v48  ;;  %v4851_v9 = vcombine.low %v390_v54, %v400_v4  ;;  %v2128_v11 = vrot.slane %v2127_v17, 4  ;;  %v404_v12 = vrot.slane %v402_v63, 4 }
  0x4a   : > { %v407_v14 = vrot.slane %v405_v2, 5  ;;  %v413_v22 = vrot.slane %v411_v6, 5  ;;  %v417_v23 = vrot.slane %v415_v7, 4  ;;  %v421_v25 = vshll.u32 %v246_v61, 16  ;;  %v6639_v7 = vld [vmem:[%s6422_s11 + $0x54] sm:$0xf] }
  0x4b   : > { %v2138_v20 = vrot.slane %v2137_v5, 4  ;;  %5456 = vmatprep.mubr.msk.bf16.mxu1 %vm715_vm3, %v4851_v9  ;;  %v2133_v26 = vsel %vm6448_vm4, %v2128_v11, %v2132_v48  ;;  %v2145_v33 = vshrl.u32 %v6605_v8, 16  ;;  %v2148_v35 = vshll.u32 %v6605_v8, 16  ;;  %v6625_v48 = vld [vmem:[%s6422_s11 + $0x4c] sm:$0xf] }
  0x4c   : > { %v408_v27 = vor.u32 %v407_v14, %v404_v12  ;;  %v418_v36 = vor.u32 %v417_v23, %v413_v22  ;;  %v423_v38 = vrot.slane %v421_v25, 5  ;;  %v2154_v39 = vshll.u32 %v6608_v18, 16 }
  0x4d   : > { %v2143_v37 = vsel %vm6448_vm4, %v2138_v20, %v2142_v59  ;;  %v2147_v46 = vrot.slane %v2145_v33, 4  ;;  %v2150_v47 = vrot.slane %v2148_v35, 5  ;;  %v2158_v54 = vshrl.u32 %v6608_v18, 16  ;;  %v249_v59 = vld [vmem:[%s6422_s11 + $0x50] sm:$0x1] }
  0x4e   : > { %v5046_v41 = vcombine.low %v2133_v26, %v2143_v37  ;;  %v409_v43 = vrot.slane %v408_v27, 4  ;;  %v419_v49 = vrot.slane %v418_v36, 4  ;;  %v2156_v53 = vrot.slane %v2154_v39, 5  ;;  %v6642_v20 = vld [vmem:[%s6422_s11 + $0x58] sm:$0xf] }
  0x4f   : > { %v2164_v57 = vshll.u32 %v6614_v28, 16  ;;  %v2151_v17 = vor.u32 %v2150_v47, %v2147_v46  ;;  %v426_v61 = vshrl.u32 %v6622_v40, 16  ;;  %v429_v63 = vshll.u32 %v6622_v40, 16  ;;  %v6649_v35 = vld [vmem:[%s6422_s11 + $0x5c] sm:$0x1] }
  0x50   : > { %5592 = vmatprep.mubr.msk.bf16.mxu0 %vm715_vm3, %v5046_v41  ;;  %v414_v58 = vsel %vm6448_vm4, %v409_v43, %v413_v22  ;;  %v424_v2 = vsel %vm6448_vm4, %v419_v49, %v423_v38  ;;  %v2160_v4 = vrot.slane %v2158_v54, 4  ;;  %v435_v6 = vshll.u32 %v6625_v48, 16 }
  0x51   : > { %v2166_v5 = vrot.slane %v2164_v57, 5  ;;  %v4852_v9 = vcombine.low %v414_v58, %v424_v2  ;;  %v2152_v11 = vrot.slane %v2151_v17, 4  ;;  %v428_v12 = vrot.slane %v426_v61, 4  ;;  %v6662_v61 = vld [vmem:[%s6422_s11 + $0x58] sm:$0xf] }
  0x52   : > { %v431_v14 = vrot.slane %v429_v63, 5  ;;  %v2161_v22 = vor.u32 %v2160_v4, %v2156_v53  ;;  %v437_v23 = vrot.slane %v435_v6, 5  ;;  %v439_v25 = vshrl.u32 %v6625_v48, 16 }
  0x53   : > { %v445_v26 = vshll.u32 %v249_v59, 16  ;;  %5457 = vmatmul.mubr.msk.bf16.gmra.mrb[8].mxu1 %vm715_vm3, %v4852_v9  ;;  %v2157_v27 = vsel %vm6448_vm4, %v2152_v11, %v2156_v53  ;;  %v2169_v37 = vshrl.u32 %v6639_v7, 16  ;;  %v2172_v36 = vshll.u32 %v6639_v7, 16  ;;  %v6656_v53 = vld [vmem:[%s6422_s11 + $0x54] sm:$0xf] }
  0x54   : > { %v432_v33 = vor.u32 %v431_v14, %v428_v12  ;;  %v2162_v38 = vrot.slane %v2161_v22, 4  ;;  %v441_v39 = vrot.slane %v439_v25, 4  ;;  %v2178_v43 = vshll.u32 %v6642_v20, 16  ;;  %v252_v9 = vld [vmem:[%s6422_s11 + $0x5c] sm:$0x1] }
  0x55   : > { %v447_v41 = vrot.slane %v445_v26, 5  ;;  %v2171_v47 = vrot.slane %v2169_v37, 4  ;;  %v2174_v49 = vrot.slane %v2172_v36, 5  ;;  %v2182_v54 = vshrl.u32 %v6642_v20, 16 }
  0x56   : > { %v433_v46 = vrot.slane %v432_v33, 4  ;;  %v2167_v57 = vsel %vm6448_vm4, %v2162_v38, %v2166_v5  ;;  %v442_v58 = vor.u32 %v441_v39, %v437_v23  ;;  %v2180_v17 = vrot.slane %v2178_v43, 5  ;;  %v6678_v39 = vld [vmem:[%s6422_s11 + $0x64] sm:$0xf] }
  0x57   : > { %v2188_v59 = vshll.u32 %v6649_v35, 16  ;;  %v5047_v63 = vcombine.low %v2157_v27, %v2167_v57  ;;  %v2175_v4 = vor.u32 %v2174_v49, %v2171_v47  ;;  %v2184_v6 = vrot.slane %v2182_v54, 4 }
  0x58   : > { %v438_v2 = vsel %vm6448_vm4, %v433_v46, %v437_v23  ;;  %v443_v11 = vrot.slane %v442_v58, 4  ;;  %v450_v14 = vshrl.u32 %v6656_v53, 16  ;;  %v453_v5 = vshll.u32 %v6656_v53, 16  ;;  %v6673_v23 = vld [vmem:[%s6422_s11 + $0x60] sm:$0xf] }
  0x59   : > { %v2190_v12 = vrot.slane %v2188_v59, 5  ;;  %5593 = vmatmul.mubr.msk.bf16.gmra.mrb[8].mxu0 %vm715_vm3, %v5047_v63  ;;  %v2176_v22 = vrot.slane %v2175_v4, 4  ;;  %v2185_v25 = vor.u32 %v2184_v6, %v2180_v17  ;;  %v459_v26 = vshll.u32 %v6662_v61, 16  ;;  %v6683_v59 = vld [vmem:[%s6422_s11 + $0x68] sm:$0x1] }
  0x5a   : > { %v463_v27 = vshrl.u32 %v6662_v61, 16  ;;  %v448_v33 = vsel %vm6448_vm4, %v443_v11, %v447_v41  ;;  %v452_v37 = vrot.slane %v450_v14, 4  ;;  %v455_v36 = vrot.slane %v453_v5, 5  ;;  %v6693_v6 = vld [vmem:[%s6422_s11 + $0x60] sm:$0xf] }
  0x5b   : > { %v469_v38 = vshll.u32 %v252_v9, 16  ;;  %v4853_v43 = vcombine.low %v438_v2, %v448_v33  ;;  %v2181_v46 = vsel %vm6448_vm4, %v2176_v22, %v2180_v17  ;;  %v2186_v47 = vrot.slane %v2185_v25, 4  ;;  %v6696_v22 = vld [vmem:[%s6422_s11 + $0x64] sm:$0xf] }
  0x5c   : > { %v461_v49 = vrot.slane %v459_v26, 5  ;;  %v456_v54 = vor.u32 %v455_v36, %v452_v37  ;;  %v465_v57 = vrot.slane %v463_v27, 4  ;;  %v2193_v41 = vshrl.u32 %v6673_v23, 16 }
  0x5d   : > { %v471_v58 = vrot.slane %v469_v38, 5  ;;  %5460 = vmatprep.mubr.msk.bf16.mxu1 %vm715_vm3, %v4853_v43  ;;  %v2191_v63 = vsel %vm6448_vm4, %v2186_v47, %v2190_v12  ;;  %v2196_v2 = vshll.u32 %v6673_v23, 16  ;;  %v2202_v4 = vshll.u32 %v6678_v39, 16 }
  0x5e   : > { %v2206_v17 = vshrl.u32 %v6678_v39, 16  ;;  %v5048_v9 = vcombine.low %v2181_v46, %v2191_v63  ;;  %v457_v11 = vrot.slane %v456_v54, 4  ;;  %v466_v14 = vor.u32 %v465_v57, %v461_v49  ;;  %v255_v54 = vld [vmem:[%s6422_s11 + $0x68] sm:$0x1] }
  0x5f   : > { %v2195_v5 = vrot.slane %v2193_v41, 4  ;;  %v2198_v25 = vrot.slane %v2196_v2, 5  ;;  %v2204_v26 = vrot.slane %v2202_v4, 5  ;;  %v2212_v12 = vshll.u32 %v6683_v59, 16 }
  0x60   : > { %v2208_v27 = vrot.slane %v2206_v17, 4  ;;  %5596 = vmatprep.mubr.msk.bf16.mxu0 %vm715_vm3, %v5048_v9  ;;  %v462_v33 = vsel %vm6448_vm4, %v457_v11, %v461_v49  ;;  %v467_v37 = vrot.slane %v466_v14, 4  ;;  %v474_v36 = vshrl.u32 %v6693_v6, 16  ;;  %v6710_v49 = vld [vmem:[%s6422_s11 + $0x6c] sm:$0xf] }
  0x61   : > { %v477_v38 = vshll.u32 %v6693_v6, 16  ;;  %v2199_v43 = vor.u32 %v2198_v25, %v2195_v5  ;;  %v2214_v47 = vrot.slane %v2212_v12, 5  ;;  %v483_v57 = vshll.u32 %v6696_v22, 16 }
  0x62   : > { %v2209_v46 = vor.u32 %v2208_v27, %v2204_v26  ;;  %v472_v41 = vsel %vm6448_vm4, %v467_v37, %v471_v58  ;;  %v476_v63 = vrot.slane %v474_v36, 4  ;;  %v487_v4 = vshrl.u32 %v6696_v22, 16 }
  0x63   : > { %v479_v2 = vrot.slane %v477_v38, 5  ;;  %v4854_v17 = vcombine.low %v462_v33, %v472_v41  ;;  %v2200_v9 = vrot.slane %v2199_v43, 4  ;;  %v485_v14 = vrot.slane %v483_v57, 5  ;;  %v6726_v38 = vld [vmem:[%s6422_s11 + $0x70] sm:$0xf] }
  0x64   : > { %v2210_v11 = vrot.slane %v2209_v46, 4  ;;  %v489_v25 = vrot.slane %v487_v4, 4  ;;  %v493_v27 = vshll.u32 %v255_v54, 16  ;;  %v5074_v58 = vrot.slane %v6428_v13, 9  ;;  %v258_v13 = vld [vmem:[%s6422_s11 + $0x74] sm:$0x1] }
  0x65   : > { %v480_v5 = vor.u32 %v479_v2, %v476_v63  ;;  %5461 = vmatmul.mubr.msk.bf16.gmra.mrb[12].mxu1 %vm715_vm3, %v4854_v17  ;;  %v2205_v33 = vsel %vm6448_vm4, %v2200_v9, %v2204_v26  ;;  %v2720_v36 = vrot.slane %v6431_v15, 5  ;;  %v498_v43 = vshrl.u32 %v6710_v49, 16 }
  0x66   : > { %v2215_v37 = vsel %vm6448_vm4, %v2210_v11, %v2214_v47  ;;  %v490_v57 = vor.u32 %v489_v25, %v485_v14  ;;  %v495_v41 = vrot.slane %v493_v27, 5  ;;  %v501_v47 = vshll.u32 %v6710_v49, 16 }
  0x67   : > { %v5049_v46 = vcombine.low %v2205_v33, %v2215_v37  ;;  %v481_v54 = vrot.slane %v480_v5, 4  ;;  %v2721_v63 = vsel %vm6714_vm7, %v5074_v58, %v2720_v36  ;;  %v2722_v2 = vrot.slane %v2720_v36, 4  ;;  %v6744_v58 = vld [vmem:[%s6422_s11 + $0x78] sm:$0xf] }
  0x68   : > { %v500_v26 = vrot.slane %v498_v43, 4  ;;  %v491_v4 = vrot.slane %v490_v57, 4  ;;  %v507_v17 = vshll.u32 %v6726_v38, 16  ;;  %v511_v9 = vshrl.u32 %v6726_v38, 16  ;;  %v6749_v43 = vld [vmem:[%s6422_s11 + $0x7c] sm:$0xf] }
  0x69   : > { %5597 = vmatmul.mubr.msk.bf16.gmra.mrb[12].mxu0 %vm715_vm3, %v5049_v46  ;;  %v486_v15 = vsel %vm6448_vm4, %v481_v54, %v485_v14  ;;  %v2724_v11 = vsel %vm6714_vm7, %v2722_v2, %v2723_v62  ;;  %v503_v5 = vrot.slane %v501_v47, 5  ;;  %v517_v25 = vshll.u32 %v258_v13, 16  ;;  %v261_v46 = vld [vmem:[%s6422_s11 + $0x80] sm:$0x1] }
  0x6a   : > { %v5075_v27 = vrot.slane %v6466_v55, 9  ;;  %v496_v33 = vsel %vm6448_vm4, %v491_v4, %v495_v41  ;;  %v5091_v14 = vcombine.low %v2721_v63, %v2724_v11  ;;  %v509_v37 = vrot.slane %v507_v17, 5 }
  0x6b   : > { %v513_v36 = vrot.slane %v511_v9, 4  ;;  %v4855_v54 = vcombine.low %v486_v15, %v496_v33  ;;  %v504_v16 = vor.u32 %v503_v5, %v500_v26  ;;  %v519_v57 = vrot.slane %v517_v25, 5  ;;  %v6774_v33 = vld [vmem:[%s6422_s11 + $0x88] sm:$0xf] }
  0x6c   : > { %v2728_v62 = vsel %vm6714_vm7, %v5075_v27, %v2727_v24  ;;  %5618 = vmatprep.mubr.msk.bf16.mxu0 %vm715_vm3, %v5091_v14  ;;  %v2729_v41 = vrot.slane %v2727_v24, 4  ;;  %v522_v13 = vshrl.u32 %v6744_v58, 16  ;;  %v525_v63 = vshll.u32 %v6744_v58, 16  ;;  %v6771_v27 = vld [vmem:[%s6422_s11 + $0x84] sm:$0xf] }
  0x6d   : > { %v514_v55 = vor.u32 %v513_v36, %v509_v37  ;;  %5464 = vmatprep.mubr.msk.bf16.mxu1 %vm715_vm3, %v4855_v54  ;;  %v505_v2 = vrot.slane %v504_v16, 4  ;;  %v531_v26 = vshll.u32 %v6749_v43, 16  ;;  %v535_v47 = vshrl.u32 %v6749_v43, 16 }
  0x6e   : > { %v541_v15 = vshll.u32 %v261_v46, 16  ;;  %v2731_v60 = vsel %vm6714_vm7, %v2729_v41, %v2730_v29  ;;  %v524_v24 = vrot.slane %v522_v13, 4  ;;  %v527_v17 = vrot.slane %v525_v63, 5  ;;  %v6782_v46 = vld [vmem:[%s8497_s1 + $0xe] sm:$0x3] }
  0x6f   : > { %v515_v4 = vrot.slane %v514_v55, 4  ;;  %v510_v9 = vsel %vm6448_vm4, %v505_v2, %v509_v37  ;;  %v5092_v11 = vcombine.low %v2728_v62, %v2731_v60  ;;  %v533_v5 = vrot.slane %v531_v26, 5  ;;  %v264_v55 = vld [vmem:[%s6422_s11 + $0x8c] sm:$0x1] }
  0x70   : > { %v537_v25 = vrot.slane %v535_v47, 4  ;;  %v528_v0 = vor.u32 %v527_v17, %v524_v24  ;;  %v543_v36 = vrot.slane %v541_v15, 5  ;;  %v5076_v29 = vrot.slane %v6500_v30, 9 }
  0x71   : > { %v520_v14 = vsel %vm6448_vm4, %v515_v4, %v519_v57  ;;  %5619 = vmatmul.mubr.msk.bf16.vlgmr.msra.gmra.mrb[0].mxu0 %vm715_vm3, %v5092_v11  ;;  %v2734_v16 = vrot.slane %v6507_v45, 5  ;;  %v2737_v62 = vrot.slane %v6512_v52, 5  ;;  %v546_v41 = vshrl.u32 %v6771_v27, 16  ;;  %v6808_v11 = vld [vmem:[%s6422_s11 + $0x94] sm:$0xf] }
  0x72   : > { %v4856_v37 = vcombine.low %v510_v9, %v520_v14  ;;  %v538_v54 = vor.u32 %v537_v25, %v533_v5  ;;  %5651 = vmatpush3.bf16.msra.mxu0 %v6480_v1  ;;  %v529_v57 = vrot.slane %v528_v0, 4  ;;  %v549_v30 = vshll.u32 %v6771_v27, 16  ;;  %v6805_v9 = vld [vmem:[%s6422_s11 + $0x90] sm:$0xf] }
  0x73   : > { %v555_v13 = vshll.u32 %v6774_v33, 16  ;;  %v2735_v45 = vsel %vm6714_vm7, %v5076_v29, %v2734_v16  ;;  %v2736_v2 = vrot.slane %v2734_v16, 4  ;;  %v559_v52 = vshrl.u32 %v6774_v33, 16  ;;  %6018 = vmatprep.subr.msk.bf16.mxu0 %vm764_vm0, %v6782_v46 }
  0x74   : > { %5465 = vmatmul.mubr.msk.bf16.gmra.mrb[16].mxu1 %vm715_vm3, %v4856_v37  ;;  %v539_v63 = vrot.slane %v538_v54, 4  ;;  %v534_v1 = vsel %vm6448_vm4, %v529_v57, %v533_v5  ;;  %v548_v26 = vrot.slane %v546_v41, 4  ;;  %v551_v47 = vrot.slane %v549_v30, 5 }
  0x75   : > { %v557_v15 = vrot.slane %v555_v13, 5  ;;  %v2738_v60 = vsel %vm6714_vm7, %v2736_v2, %v2737_v62  ;;  %v561_v24 = vrot.slane %v559_v52, 4  ;;  %v565_v17 = vshll.u32 %v264_v55, 16  ;;  %v6816_v62 = vld [vmem:[%s6422_s11 + $0x98] sm:$0x1] }
  0x76   : > { %v544_v4 = vsel %vm6448_vm4, %v539_v63, %v543_v36  ;;  %v5093_v14 = vcombine.low %v2735_v45, %v2738_v60  ;;  %v552_v0 = vor.u32 %v551_v47, %v548_v26  ;;  %v5077_v5 = vrot.slane %v6530_v21, 9  ;;  %v6835_v60 = vld [vmem:[%s6422_s11 + $0xa0] sm:$0xf] }
  0x77   : > { %v4857_v25 = vcombine.low %v534_v1, %v544_v4  ;;  %v562_v29 = vor.u32 %v561_v24, %v557_v15  ;;  %v567_v37 = vrot.slane %v565_v17, 5  ;;  %v2741_v54 = vrot.slane %v6536_v34, 5  ;;  %v6832_v4 = vld [vmem:[%s6422_s11 + $0x9c] sm:$0xf] }
  0x78   : > { %v2744_v36 = vrot.slane %v6545_v42, 5  ;;  %5622 = vmatprep.mubr.msk.bf16.mxu0 %vm715_vm3, %v5093_v14  ;;  %v553_v16 = vrot.slane %v552_v0, 4  ;;  %v570_v57 = vshrl.u32 %v6805_v9, 16  ;;  %v573_v55 = vshll.u32 %v6805_v9, 16 }
  0x79   : > { %5468 = vmatprep.mubr.msk.bf16.mxu1 %vm715_vm3, %v4857_v25  ;;  %v579_v21 = vshll.u32 %v6808_v11, 16  ;;  %v563_v41 = vrot.slane %v562_v29, 4  ;;  %v2742_v34 = vsel %vm6714_vm7, %v5077_v5, %v2741_v54  ;;  %v2743_v42 = vrot.slane %v2741_v54, 4  ;;  %v270_v54 = vld [vmem:[%s6422_s11 + $0xa4] sm:$0x1] }
  0x7a   : > { %v583_v30 = vshrl.u32 %v6808_v11, 16  ;;  %v558_v13 = vsel %vm6448_vm4, %v553_v16, %v557_v15  ;;  %v572_v63 = vrot.slane %v570_v57, 4  ;;  %v575_v45 = vrot.slane %v573_v55, 5 }
  0x7b   : > { %v581_v2 = vrot.slane %v579_v21, 5  ;;  %v568_v52 = vsel %vm6448_vm4, %v563_v41, %v567_v37  ;;  %v2745_v1 = vsel %vm6714_vm7, %v2743_v42, %v2744_v36  ;;  %v589_v47 = vshll.u32 %v6816_v62, 16 }
  0x7c   : > { %v585_v26 = vrot.slane %v583_v30, 4  ;;  %v4858_v24 = vcombine.low %v558_v13, %v568_v52  ;;  %v5094_v17 = vcombine.low %v2742_v34, %v2745_v1  ;;  %v576_v15 = vor.u32 %v575_v45, %v572_v63  ;;  %v6856_v52 = vld [vmem:[%s6422_s11 + $0xa8] sm:$0xf]  ;;  %v6859_v1 = vld [vmem:[%s6422_s11 + $0xac] sm:$0xf] }
  0x7d   : > { %v5078_v25 = vrot.slane %v6567_v10, 9  ;;  %v591_v0 = vrot.slane %v589_v47, 5  ;;  %v2748_v5 = vrot.slane %v6573_v19, 5  ;;  %v2751_v29 = vrot.slane %v6578_v31, 5  ;;  %8529 = vst [vmem:[#allocation6_spill] sm:$0xff] %v6856_v52 }
  0x7e   : > { %v586_v14 = vor.u32 %v585_v26, %v581_v2  ;;  %5469 = vmatmul.mubr.msk.bf16.gmra.mrb[20].mxu1 %vm715_vm3, %v4858_v24  ;;  %5623 = vmatmul.mubr.msk.bf16.gmra.mrb[4].mxu0 %vm715_vm3, %v5094_v17  ;;  %v577_v37 = vrot.slane %v576_v15, 4  ;;  %v594_v36 = vshrl.u32 %v6832_v4, 16  ;;  %v597_v16 = vshll.u32 %v6832_v4, 16 }
  0x7f   : > { %v603_v10 = vshll.u32 %v6835_v60, 16  ;;  %v2749_v19 = vsel %vm6714_vm7, %v5078_v25, %v2748_v5  ;;  %v2750_v55 = vrot.slane %v2748_v5, 4  ;;  %v607_v31 = vshrl.u32 %v6835_v60, 16  ;;  %v6867_v5 = vld [vmem:[%s6422_s11 + $0xb0] sm:$0x1] }
  0x80   : > { %v587_v57 = vrot.slane %v586_v14, 4  ;;  %v582_v21 = vsel %vm6448_vm4, %v577_v37, %v581_v2  ;;  %v596_v41 = vrot.slane %v594_v36, 4  ;;  %v599_v34 = vrot.slane %v597_v16, 5  ;;  %8530 = vst [vmem:[#allocation7_spill] sm:$0xff] %v6867_v5 }
  0x81   : > { %v605_v42 = vrot.slane %v603_v10, 5  ;;  %v2752_v13 = vsel %vm6714_vm7, %v2750_v55, %v2751_v29  ;;  %v609_v63 = vrot.slane %v607_v31, 4  ;;  %v613_v45 = vshll.u32 %v270_v54, 16 }
  0x82   : > { %v592_v30 = vsel %vm6448_vm4, %v587_v57, %v591_v0  ;;  %v5095_v47 = vcombine.low %v2749_v19, %v2752_v13  ;;  %v600_v24 = vor.u32 %v599_v34, %v596_v41  ;;  %v5079_v2 = vrot.slane %v6605_v8, 9  ;;  %v6883_v34 = vld [vmem:[%s6422_s11 + $0xb4] sm:$0xf] }
  0x83   : > { %v4859_v26 = vcombine.low %v582_v21, %v592_v30  ;;  %v610_v17 = vor.u32 %v609_v63, %v605_v42  ;;  %v615_v15 = vrot.slane %v613_v45, 5  ;;  %v2755_v25 = vrot.slane %v6608_v18, 5  ;;  %8531 = vst [vmem:[#allocation8_spill] sm:$0xff] %v6883_v34  ;;  %v6886_v30 = vld [vmem:[%s6422_s11 + $0xb8] sm:$0xf] }
  0x84   : > { %v2758_v14 = vrot.slane %v6614_v28, 5  ;;  %5626 = vmatprep.mubr.msk.bf16.mxu0 %vm715_vm3, %v5095_v47  ;;  %v601_v0 = vrot.slane %v600_v24, 4  ;;  %v618_v29 = vshrl.u32 %v6856_v52, 16  ;;  %v621_v37 = vshll.u32 %v6856_v52, 16  ;;  %8532 = vst [vmem:[#allocation9_spill] sm:$0xff] %v6886_v30 }
  0x85   : > { %5472 = vmatprep.mubr.msk.bf16.mxu1 %vm715_vm3, %v4859_v26  ;;  %v627_v8 = vshll.u32 %v6859_v1, 16  ;;  %v611_v54 = vrot.slane %v610_v17, 4  ;;  %v2756_v18 = vsel %vm6714_vm7, %v5079_v2, %v2755_v25  ;;  %v2757_v28 = vrot.slane %v2755_v25, 4 }
  0x86   : > { %v631_v36 = vshrl.u32 %v6859_v1, 16  ;;  %v606_v16 = vsel %vm6448_vm4, %v601_v0, %v605_v42  ;;  %v620_v10 = vrot.slane %v618_v29, 4  ;;  %v623_v57 = vrot.slane %v621_v37, 5 }
  0x87   : > { %v629_v19 = vrot.slane %v627_v8, 5  ;;  %v616_v55 = vsel %vm6448_vm4, %v611_v54, %v615_v15  ;;  %v2759_v31 = vsel %vm6714_vm7, %v2757_v28, %v2758_v14  ;;  %v637_v41 = vshll.u32 %v6867_v5, 16  ;;  %v6894_v15 = vld [vmem:[%s6422_s11 + $0xbc] sm:$0x1]  ;;  %v4984_v28 = vld [vmem:[%s6422_s11 + $0x6c] sm:$0xf] }
  0x88   : > { %v633_v21 = vrot.slane %v631_v36, 4  ;;  %v4860_v13 = vcombine.low %v606_v16, %v616_v55  ;;  %v5096_v63 = vcombine.low %v2756_v18, %v2759_v31  ;;  %v624_v42 = vor.u32 %v623_v57, %v620_v10  ;;  %8533 = vst [vmem:[#allocation10_spill] sm:$0xff] %v6894_v15  ;;  %v4985_v55 = vld [vmem:[%s6422_s11 + $0x70] sm:$0xf]  ;;  %v4986_v31 = vld [vmem:[%s6422_s11 + $0x74] sm:$0x1] }
  0x89   : > { %v5080_v45 = vrot.slane %v6639_v7, 9  ;;  %v639_v47 = vrot.slane %v637_v41, 5  ;;  %v2762_v24 = vrot.slane %v6642_v20, 5  ;;  %v2765_v2 = vrot.slane %v6649_v35, 5  ;;  %v6151_v5 = vld [vmem:[%s6422_s11 + $0x64] sm:$0xf] }
  0x8a   : > { %v634_v26 = vor.u32 %v633_v21, %v629_v19  ;;  %5473 = vmatmul.mubr.msk.bf16.gmra.mrb[24].mxu1 %vm715_vm3, %v4860_v13  ;;  %5627 = vmatmul.mubr.msk.bf16.gmra.mrb[8].mxu0 %vm715_vm3, %v5096_v63  ;;  %v625_v17 = vrot.slane %v624_v42, 4  ;;  %v642_v25 = vshrl.u32 %v6883_v34, 16  ;;  %v645_v14 = vshll.u32 %v6883_v34, 16 }
  0x8b   : > { %v651_v7 = vshll.u32 %v6886_v30, 16  ;;  %v2763_v20 = vsel %vm6714_vm7, %v5080_v45, %v2762_v24  ;;  %v2764_v35 = vrot.slane %v2762_v24, 4  ;;  %v655_v29 = vshrl.u32 %v6886_v30, 16 }
  0x8c   : > { %v635_v0 = vrot.slane %v634_v26, 4  ;;  %v630_v37 = vsel %vm6448_vm4, %v625_v17, %v629_v19  ;;  %v644_v8 = vrot.slane %v642_v25, 4  ;;  %v647_v54 = vrot.slane %v645_v14, 5 }
  0x8d   : > { %v653_v18 = vrot.slane %v651_v7, 5  ;;  %v2766_v16 = vsel %vm6714_vm7, %v2764_v35, %v2765_v2  ;;  %v657_v10 = vrot.slane %v655_v29, 4  ;;  %v661_v57 = vshll.u32 %v6894_v15, 16  ;;  %v6928_v35 = vld [vmem:[%s6422_s11] sm:$0xf] }
  0x8e   : > { %v640_v36 = vsel %vm6448_vm4, %v635_v0, %v639_v47  ;;  %v5097_v41 = vcombine.low %v2763_v20, %v2766_v16  ;;  %v648_v13 = vor.u32 %v647_v54, %v644_v8  ;;  %v5081_v19 = vrot.slane %v6673_v23, 9  ;;  %v6931_v29 = vld [vmem:[%s6422_s11 + $0x4] sm:$0xf]  ;;  %v4987_v8 = vld [vmem:[%s6422_s11 + $0x78] sm:$0xf] }
  0x8f   : > { %v4861_v21 = vcombine.low %v630_v37, %v640_v36  ;;  %v658_v63 = vor.u32 %v657_v10, %v653_v18  ;;  %v663_v42 = vrot.slane %v661_v57, 5  ;;  %v2769_v45 = vrot.slane %v6678_v39, 5  ;;  %v4988_v54 = vld [vmem:[%s6422_s11 + $0x7c] sm:$0xf]  ;;  %v4989_v16 = vld [vmem:[%s6422_s11 + $0x80] sm:$0x1] }
  0x90   : > { %v2772_v26 = vrot.slane %v6683_v59, 5  ;;  %5630 = vmatprep.mubr.msk.bf16.mxu0 %vm715_vm3, %v5097_v41  ;;  %v649_v47 = vrot.slane %v648_v13, 4  ;;  %v5082_v24 = vrot.slane %v4984_v28, 9  ;;  %v2776_v2 = vrot.slane %v4985_v55, 5  ;;  %v4990_v10 = vld [vmem:[%s6422_s11 + $0x84] sm:$0xf] }
  0x91   : > { %5476 = vmatprep.mubr.msk.bf16.mxu1 %vm715_vm3, %v4861_v21  ;;  %v2779_v17 = vrot.slane %v4986_v31, 5  ;;  %v659_v25 = vrot.slane %v658_v63, 4  ;;  %v2770_v23 = vsel %vm6714_vm7, %v5081_v19, %v2769_v45  ;;  %v2771_v39 = vrot.slane %v2769_v45, 4  ;;  %v4991_v55 = vld [vmem:[%s6422_s11 + $0x88] sm:$0xf] }
  0x92   : > { %v654_v59 = vsel %vm6448_vm4, %v649_v47, %v653_v18  ;;  %v2777_v14 = vsel %vm6714_vm7, %v5082_v24, %v2776_v2  ;;  %v2778_v7 = vrot.slane %v2776_v2, 4  ;;  %v4879_v37 = vcombine.low %v6928_v35, %v6931_v29  ;;  %v4992_v41 = vld [vmem:[%s6422_s11 + $0x8c] sm:$0x1]  ;;  %v4994_v13 = vld [vmem:[%s6422_s11 + $0x94] sm:$0xf] }
  0x93   : > { %v664_v0 = vsel %vm6448_vm4, %v659_v25, %v663_v42  ;;  %v2773_v20 = vsel %vm6714_vm7, %v2771_v39, %v2772_v26  ;;  %v5083_v31 = vrot.slane %v4987_v8, 9  ;;  %v2783_v21 = vrot.slane %v4988_v54, 5  ;;  %v4993_v42 = vld [vmem:[%s6422_s11 + $0x90] sm:$0xf]  ;;  %v4995_v45 = vld [vmem:[%s6422_s11 + $0x98] sm:$0x1] }
  0x94   : > { %v4862_v18 = vcombine.low %v654_v59, %v664_v0  ;;  %v5098_v28 = vcombine.low %v2770_v23, %v2773_v20  ;;  %v2780_v36 = vsel %vm6714_vm7, %v2778_v7, %v2779_v17  ;;  %v2786_v19 = vrot.slane %v4989_v16, 5  ;;  %v4996_v2 = vld [vmem:[%s6422_s11 + $0x9c] sm:$0xf]  ;;  %v4997_v17 = vld [vmem:[%s6422_s11 + $0xa0] sm:$0xf] }
  0x95   : > { %v5099_v57 = vcombine.low %v2777_v14, %v2780_v36  ;;  %v5084_v63 = vrot.slane %v4990_v10, 9  ;;  %v2784_v26 = vsel %vm6714_vm7, %v5083_v31, %v2783_v21  ;;  %v2785_v47 = vrot.slane %v2783_v21, 4  ;;  %v6955_v25 = vld [vmem:[%s6422_s11 + $0xc] sm:$0xf]  ;;  %v6958_v23 = vld [vmem:[%s6422_s11 + $0x10] sm:$0xf] }
  0x96   : > { %5477 = vmatmul.mubr.msk.bf16.gmra.mrb[28].mxu1 %vm715_vm3, %v4862_v18  ;;  %5631 = vmatmul.mubr.msk.bf16.gmra.mrb[12].mxu0 %vm715_vm3, %v5098_v28  ;;  %v2790_v24 = vrot.slane %v4991_v55, 5  ;;  %v4880_v39 = vcombine.low %v6955_v25, %v6958_v23  ;;  %v6130_v59 = vld [vmem:[%s8497_s1 + $0x4] sm:$0x3]  ;;  %v2793_v7 = vrot.slane %v4992_v41, 5  ;;  %v2797_v0 = vrot.slane %v4994_v13, 5 }
  0x97   : > { %5482 = vmatprep.mubr.msk.bf16.mxu1 %vm715_vm3, %v4879_v37  ;;  %5634 = vmatprep.mubr.msk.bf16.mxu0 %vm715_vm3, %v5099_v57  ;;  %v1451_v14 = vsel %vm764_vm0, %v6130_v59, 0  ;;  %v4998_v20 = vld [vmem:[%s6422_s11 + $0xa4] sm:$0x1]  ;;  %v2787_v37 = vsel %vm6714_vm7, %v2785_v47, %v2786_v19  ;;  %v6970_v8 = vld [vmem:[%s6422_s11 + $0x18] sm:$0xf]  ;;  %v5085_v10 = vrot.slane %v4993_v42, 9 }
  0x98   : > { %v6973_v54 = vld [vmem:[%s6422_s11 + $0x1c] sm:$0xf]  ;;  %v2791_v28 = vsel %vm6714_vm7, %v5084_v63, %v2790_v24  ;;  %v2792_v36 = vrot.slane %v2790_v24, 4  ;;  %v5100_v16 = vcombine.low %v2784_v26, %v2787_v37  ;;  %v2799_v57 = vrot.slane %v2797_v0, 4  ;;  %v5000_v19 = vld [vmem:[%s6422_s11 + $0xac] sm:$0xf] }
  0x99   : > { %v4881_v18 = vcombine.low %v6970_v8, %v6973_v54  ;;  %v2800_v55 = vrot.slane %v4995_v45, 5  ;;  %v5086_v21 = vrot.slane %v4996_v2, 9  ;;  %v2804_v41 = vrot.slane %v4997_v17, 5  ;;  %v5003_v59 = vld [vmem:[%s6422_s11 + $0xb8] sm:$0xf] }
  0x9a   : > { %v2794_v31 = vsel %vm6714_vm7, %v2792_v36, %v2793_v7  ;;  %v2807_v13 = vrot.slane %v4998_v20, 5  ;;  %v6986_v63 = vld [vmem:[%s8497_s1 + $0x6] sm:$0x3]  ;;  %v2798_v45 = vsel %vm6714_vm7, %v5085_v10, %v2797_v0  ;;  %v2811_v24 = vrot.slane %v5000_v19, 5  ;;  %v5001_v7 = vld [vmem:[%s6422_s11 + $0xb0] sm:$0x1] }
  0x9b   : > { %v5101_v47 = vcombine.low %v2791_v28, %v2794_v31  ;;  %v2806_v42 = vrot.slane %v2804_v41, 4  ;;  %v2801_v26 = vsel %vm6714_vm7, %v2799_v57, %v2800_v55  ;;  %v2805_v2 = vsel %vm6714_vm7, %v5086_v21, %v2804_v41  ;;  %v5002_v0 = vld [vmem:[%s6422_s11 + $0xb4] sm:$0xf]  ;;  %v5004_v20 = vld [vmem:[%s6422_s11 + $0xbc] sm:$0x1] }
  0x9c   : > { %v7007_v37 = vld [vmem:[%s6422_s11 + $0x24] sm:$0xf]  ;;  %v5102_v36 = vcombine.low %v2798_v45, %v2801_v26  ;;  %v2813_v55 = vrot.slane %v2811_v24, 4  ;;  %v2814_v31 = vrot.slane %v5001_v7, 5  ;;  %v5088_v21 = vrot.slane %v5002_v0, 9 }
  0x9d   : > { %v2808_v17 = vsel %vm6714_vm7, %v2806_v42, %v2807_v13  ;;  %v2821_v13 = vrot.slane %v5004_v20, 5  ;;  %v5006_v19 = vld [vmem:[%s6422_s11 + $0xc4] sm:$0xf]  ;;  %v5005_v45 = vld [vmem:[%s6422_s11 + $0xc0] sm:$0xf] }
  0x9e   : > { %5483 = vmatmul.mubr.msk.bf16.vlgmr.msra.gmra.mrb[0].mxu1 %vm715_vm3, %v4880_v39  ;;  %5635 = vmatmul.mubr.msk.bf16.gmra.mrb[16].mxu0 %vm715_vm3, %v5100_v16  ;;  %v4999_v39 = vld [vmem:[%s6422_s11 + $0xa8] sm:$0xf]  ;;  %v4883_v16 = vcombine.low %v6549_v44, %v6555_v56  ;;  %v5103_v10 = vcombine.low %v2805_v2, %v2808_v17  ;;  %v2815_v56 = vsel %vm6714_vm7, %v2813_v55, %v2814_v31  ;;  %v5089_v7 = vrot.slane %v5005_v45, 9 }
  0x9f   : > { %5515 = vmatpush3.bf16.msra.mxu1 %v1451_v14  ;;  %5486 = vmatprep.mubr.msk.bf16.mxu1 %vm715_vm3, %v4881_v18  ;;  %v2818_v14 = vrot.slane %v5003_v59, 5  ;;  %v7010_v18 = vld [vmem:[%s6422_s11 + $0x28] sm:$0xf]  ;;  %v5087_v57 = vrot.slane %v4999_v39, 9  ;;  %v4884_v2 = vcombine.low %v6586_v50, %v6592_v51  ;;  %v4889_v55 = vcombine.low %v6744_v58, %v6749_v43  ;;  %v7093_v58 = vld [vmem:[%s6422_s11 + $0x40] sm:$0xf] }
  0xa0   : > { %5638 = vmatprep.mubr.msk.bf16.mxu0 %vm715_vm3, %v5101_v47  ;;  %6013 = vmatprep.subr.msk.bf16.mxu1 %vm764_vm0, %v6986_v63  ;;  %v4882_v28 = vcombine.low %v7007_v37, %v7010_v18  ;;  %v2825_v47 = vrot.slane %v5006_v19, 5  ;;  %v5007_v26 = vld [vmem:[%s6422_s11 + $0xc8] sm:$0x1]  ;;  %v3985_v31 = vsel %vm764_vm0, %v6782_v46, 0  ;;  %v4890_v45 = vcombine.low %v6771_v27, %v6774_v33 }
  0xa1   : > { %v2820_v41 = vrot.slane %v2818_v14, 4  ;;  %v2812_v44 = vsel %vm6714_vm7, %v5087_v57, %v2811_v24  ;;  %v2819_v59 = vsel %vm6714_vm7, %v5088_v21, %v2818_v14  ;;  %v4885_v24 = vcombine.low %v6622_v40, %v6625_v48  ;;  %v7044_v40 = vld [vmem:[%s6422_s11 + $0x18] sm:$0xf]  ;;  %v7047_v48 = vld [vmem:[%s6422_s11 + $0x1c] sm:$0xf] }
  0xa2   : > { %v5104_v17 = vcombine.low %v2812_v44, %v2815_v56  ;;  %v2827_v0 = vrot.slane %v2825_v47, 4  ;;  %v2828_v20 = vrot.slane %v5007_v26, 5  ;;  %v2826_v50 = vsel %vm6714_vm7, %v5089_v7, %v2825_v47  ;;  %v7097_v46 = vld [vmem:[%s6422_s11 + $0x48] sm:$0xf]  ;;  %v7110_v47 = vld [vmem:[%s6422_s11 + $0x14] sm:$0x1] }
  0xa3   : > { %v2822_v42 = vsel %vm6714_vm7, %v2820_v41, %v2821_v13  ;;  %v4886_v14 = vcombine.low %v6656_v53, %v6662_v61  ;;  %v7063_v53 = vld [vmem:[%s6422_s11 + $0x28] sm:$0xf]  ;;  %v7066_v61 = vld [vmem:[%s6422_s11 + $0x30] sm:$0xf]  ;;  %v7100_v13 = vld [vmem:[%s6422_s11 + $0x4c] sm:$0xf] }
  0xa4   : > { %v5105_v39 = vcombine.low %v2819_v59, %v2822_v42  ;;  %v2829_v51 = vsel %vm6714_vm7, %v2827_v0, %v2828_v20  ;;  %v7084_v41 = vld [vmem:[%s8497_s1 + $0x10] sm:$0x3]  ;;  %v7105_v19 = vld [vmem:[%s6422_s11 + $0x8] sm:$0x1]  ;;  %v1249_v56 = vrot.slane %v6958_v23, 5  ;;  %v1252_v59 = vrot.slane %v7110_v47, 5 }
  0xa5   : > { %v1245_v44 = vrot.slane %v7105_v19, 5  ;;  %v4891_v23 = vcombine.low %v6805_v9, %v6808_v11  ;;  %v7128_v7 = vld [vmem:[%s6422_s11 + $0x58] sm:$0xf]  ;;  %v1256_v9 = vrot.slane %v6973_v54, 5  ;;  %v7197_v33 = vld [vmem:[%s6422_s11 + $0x88] sm:$0xf] }
  0xa6   : > { %5487 = vmatmul.mubr.msk.bf16.gmra.mrb[4].mxu1 %vm715_vm3, %v4882_v28  ;;  %5639 = vmatmul.mubr.msk.bf16.gmra.mrb[20].mxu0 %vm715_vm3, %v5102_v36  ;;  %v5106_v28 = vcombine.low %v2826_v50, %v2829_v51  ;;  %v4887_v36 = vcombine.low %v6693_v6, %v6696_v22  ;;  %v7069_v6 = vld [vmem:[%s6422_s11 + $0x34] sm:$0xf]  ;;  %v4888_v22 = vcombine.low %v6710_v49, %v6726_v38  ;;  %v7090_v49 = vld [vmem:[%s6422_s11 + $0x3c] sm:$0xf]  ;;  %v7135_v50 = vld [vmem:[%s6422_s11 + $0x60] sm:$0xf] }
  0xa7   : > { %5490 = vmatprep.mubr.msk.bf16.mxu1 %vm715_vm3, %v4883_v16  ;;  %5642 = vmatprep.mubr.msk.bf16.mxu0 %vm715_vm3, %v5103_v10  ;;  %v5172_v16 = vcombine.low %v7044_v40, %v7047_v48  ;;  %v7060_v10 = vld [vmem:[%s6422_s11 + $0x24] sm:$0xf]  ;;  %v5174_v21 = vcombine.low %v7066_v61, %v7069_v6  ;;  %v5175_v26 = vcombine.low %v7090_v49, %v7093_v58  ;;  %v4913_v27 = vrot.slane %v6970_v8, 9  ;;  %v7221_v0 = vld [vmem:[%s6422_s11 + $0x94] sm:$0xf] }
  0xa8   : > { %v5173_v57 = vcombine.low %v7060_v10, %v7063_v53  ;;  %8534 = vst [vmem:[#allocation11_spill] sm:$0xff] %v7135_v50  ;;  %v4894_v51 = vcombine.low %v6883_v34, %v6886_v30  ;;  %v7229_v19 = vsel %vm764_vm0, %v6986_v63, 0  ;;  %v7247_v8 = vld [vmem:[%s6422_s11 + $0x9c] sm:$0xf]  ;;  %v7259_v54 = vld [vmem:[%s6422_s11 + $0xa8] sm:$0xf] }
  0xa9   : > { %v6142_v42 = vld [vmem:[%s6422_s11 + $0x40] sm:$0xf]  ;;  %v7328_v34 = vld [vmem:[%s6422_s11 + $0xc4] sm:$0xf] }
  0xae   : > { %5491 = vmatmul.mubr.msk.bf16.gmra.mrb[8].mxu1 %vm715_vm3, %v4884_v2  ;;  %5643 = vmatmul.mubr.msk.bf16.gmra.mrb[24].mxu0 %vm715_vm3, %v5104_v17  ;;  %v7211_v17 = vld [vmem:[%s6422_s11 + $0x90] sm:$0xf]  ;;  %v7264_v2 = vld [vmem:[%s6422_s11 + $0xac] sm:$0xf] }
  0xaf   : > { %5494 = vmatprep.mubr.msk.bf16.mxu1 %vm715_vm3, %v4885_v24  ;;  %5646 = vmatprep.mubr.msk.bf16.mxu0 %vm715_vm3, %v5105_v39  ;;  %v5176_v24 = vcombine.low %v7097_v46, %v7100_v13  ;;  %v7125_v39 = vld [vmem:[%s6422_s11 + $0x54] sm:$0xf]  ;;  %8540 = vst [vmem:[#allocation17_spill] sm:$0xff] %v7211_v17 }
  0xb0   : > { %v5177_v47 = vcombine.low %v7125_v39, %v7128_v7 }
  0xb6   : > { %5495 = vmatmul.mubr.msk.bf16.gmra.mrb[12].mxu1 %vm715_vm3, %v4886_v14  ;;  %5647 = vmatmul.mubr.msk.bf16.gmra.mrb[28].mxu0 %vm715_vm3, %v5106_v28  ;;  %v1277_v28 = vrot.slane %v6142_v42, 5  ;;  %v6143_v42 = vld [vmem:[%s6422_s11 + $0x4c] sm:$0xf] }
  0xb7   : > { %5498 = vmatprep.mubr.msk.bf16.mxu1 %vm715_vm3, %v4887_v36  ;;  %5652 = vmatprep.mubr.msk.bf16.mxu0 %vm715_vm3, %v5172_v16  ;;  %v7142_v36 = vld [vmem:[%s6422_s11 + $0x64] sm:$0xf] }
  0xbe   : > { %5499 = vmatmul.mubr.msk.bf16.gmra.mrb[16].mxu1 %vm715_vm3, %v4888_v22  ;;  %5653 = vmatmul.mubr.msk.bf16.vlgmr.msra.gmra.mrb[0].mxu0 %vm715_vm3, %v5173_v57  ;;  %v7176_v22 = vld [vmem:[%s6422_s11 + $0x7c] sm:$0xf]  ;;  %v1251_v57 = vrot.slane %v1249_v56, 4 }
  0xbf   : > { %5685 = vmatpush3.bf16.msra.mxu0 %v3985_v31  ;;  %5502 = vmatprep.mubr.msk.bf16.mxu1 %vm715_vm3, %v4889_v55  ;;  %v1242_v55 = vrot.slane %v6931_v29, 5  ;;  %v7168_v31 = vld [vmem:[%s6422_s11 + $0x70] sm:$0xf]  ;;  %8538 = vst [vmem:[#allocation15_spill] sm:$0xff] %v7176_v22  ;;  %v4912_v29 = vrot.slane %v6955_v25, 9 }
  0xc0   : > { %5656 = vmatprep.mubr.msk.bf16.mxu0 %vm715_vm3, %v5174_v21  ;;  %6019 = vmatprep.subr.msk.bf16.mxu0 %vm764_vm0, %v7084_v41  ;;  %v4892_v21 = vcombine.low %v6832_v4, %v6835_v60  ;;  %8536 = vst [vmem:[#allocation13_spill] sm:$0xff] %v7168_v31  ;;  %v7171_v4 = vld [vmem:[%s6422_s11 + $0x78] sm:$0xf]  ;;  %v7189_v25 = vld [vmem:[%s6422_s11 + $0x84] sm:$0xf]  ;;  %v7207_v16 = vsel %vm6714_vm7, %v1251_v57, %v1252_v59  ;;  %v1263_v59 = vrot.slane %v7010_v18, 5 }
  0xc1   : > { %8537 = vst [vmem:[#allocation14_spill] sm:$0xff] %v7171_v4  ;;  %v1244_v14 = vrot.slane %v1242_v55, 4  ;;  %8539 = vst [vmem:[#allocation16_spill] sm:$0xff] %v7189_v25  ;;  %v7203_v20 = vsel %vm6714_vm7, %v4912_v29, %v1249_v56  ;;  %v1258_v56 = vrot.slane %v1256_v9, 4  ;;  %v6141_v18 = vld [vmem:[%s6422_s11 + $0x38] sm:$0x1] }
  0xc6   : > { %5503 = vmatmul.mubr.msk.bf16.gmra.mrb[20].mxu1 %vm715_vm3, %v4890_v45  ;;  %5657 = vmatmul.mubr.msk.bf16.gmra.mrb[4].mxu0 %vm715_vm3, %v5175_v26  ;;  %v7159_v26 = vld [vmem:[%s6422_s11 + $0x6c] sm:$0xf]  ;;  %v4911_v45 = vrot.slane %v6928_v35, 9 }
  0xc7   : > { %5506 = vmatprep.mubr.msk.bf16.mxu1 %vm715_vm3, %v4891_v23  ;;  %5660 = vmatprep.mubr.msk.bf16.mxu0 %vm715_vm3, %v5176_v24  ;;  %8535 = vst [vmem:[#allocation12_spill] sm:$0xff] %v7159_v26  ;;  %v4893_v23 = vcombine.low %v6856_v52, %v6859_v1  ;;  %v5178_v24 = vcombine.low %v7135_v50, %v7142_v36  ;;  %v8543_v52 = vshll.u32 %v7044_v40, 16 }
  0xc8   : > { %v5179_v35 = vcombine.low %v7159_v26, %v7168_v31  ;;  %v1243_v60 = vsel %vm6714_vm7, %v4911_v45, %v1242_v55  ;;  %v1246_v55 = vsel %vm6714_vm7, %v1244_v14, %v1245_v44  ;;  %v6137_v45 = vld [vmem:[%s6422_s11 + $0x20] sm:$0x1]  ;;  %v6138_v14 = vld [vmem:[%s6422_s11 + $0x34] sm:$0xf]  ;;  %v1298_v31 = vrot.slane %v6151_v5, 5 }
  0xc9   : > { %v1259_v29 = vrot.slane %v6137_v45, 5  ;;  %v1270_v57 = vrot.slane %v6138_v14, 5  ;;  %v4928_v63 = vcombine.low %v1243_v60, %v1246_v55  ;;  %v4914_v14 = vrot.slane %v7007_v37, 9  ;;  %v6139_v55 = vld [vmem:[%s6422_s11 + $0x2c] sm:$0x1] }
  0xca   : > { %v1265_v60 = vrot.slane %v1263_v59, 4  ;;  %v1273_v37 = vrot.slane %v6141_v18, 5  ;;  %v6146_v45 = vld [vmem:[%s6422_s11 + $0x58] sm:$0xf]  ;;  %v6149_v26 = vld [vmem:[%s6422_s11 + $0x54] sm:$0xf] }
  0xcb   : > { %v1272_v44 = vrot.slane %v1270_v57, 4  ;;  %v7276_v18 = vsel %vm6714_vm7, %v4914_v14, %v1263_v59  ;;  %v7293_v14 = vld [vmem:[%s6422_s11 + $0xb4] sm:$0xf]  ;;  %v4918_v30 = vrot.slane %v6149_v26, 9  ;;  %v8544_v5 = vshrl.u32 %v7047_v48, 16 }
  0xce   : > { %5507 = vmatmul.mubr.msk.bf16.gmra.mrb[24].mxu1 %vm715_vm3, %v4892_v21  ;;  %5661 = vmatmul.mubr.msk.bf16.gmra.mrb[8].mxu0 %vm715_vm3, %v5177_v47  ;;  %v7250_v21 = vld [vmem:[%s6422_s11 + $0xa0] sm:$0xf]  ;;  %v1266_v47 = vrot.slane %v6139_v55, 5 }
  0xcf   : > { %5510 = vmatprep.mubr.msk.bf16.mxu1 %vm715_vm3, %v4893_v23  ;;  %5664 = vmatprep.mubr.msk.bf16.mxu0 %vm715_vm3, %v5178_v24  ;;  %v7241_v24 = vsel %vm6714_vm7, %v4913_v27, %v1256_v9  ;;  %v7254_v23 = vsel %vm6714_vm7, %v1258_v56, %v1259_v29  ;;  %v6140_v27 = vld [vmem:[%s6422_s11 + $0x30] sm:$0xf]  ;;  %v6145_v56 = vld [vmem:[%s6422_s11 + $0x44] sm:$0x1] }
  0xd0   : > { %v4915_v9 = vrot.slane %v6140_v27, 9  ;;  %v7284_v27 = vsel %vm6714_vm7, %v1265_v60, %v1266_v47  ;;  %v6144_v47 = vld [vmem:[%s6422_s11 + $0x3c] sm:$0xf]  ;;  %v1280_v59 = vrot.slane %v6145_v56, 5  ;;  %v7320_v56 = vld [vmem:[%s6422_s11 + $0xc0] sm:$0xf] }
  0xd1   : > { %v4916_v60 = vrot.slane %v6144_v47, 9  ;;  %v6147_v47 = vld [vmem:[%s6422_s11 + $0x48] sm:$0xf] }
  0xd2   : > { %v7288_v29 = vsel %vm6714_vm7, %v4915_v9, %v1270_v57  ;;  %v7306_v57 = vsel %vm6714_vm7, %v1272_v44, %v1273_v37  ;;  %v1279_v9 = vrot.slane %v1277_v28, 4  ;;  %v4917_v15 = vrot.slane %v6147_v47, 9 }
  0xd3   : > { %v7332_v37 = vsel %vm6714_vm7, %v4916_v60, %v1277_v28  ;;  %v3508_v28 = vrot.slane %v8543_v52, 5  ;;  %v8546_v52 = vcombine.low %v7189_v25, %v7197_v33 }
  0xd4   : > { %v7336_v47 = vsel %vm6714_vm7, %v1279_v9, %v1280_v59  ;;  %v7352_v59 = vld [vmem:[%s6422_s11 + $0xcc] sm:$0xf]  ;;  %v3518_v9 = vrot.slane %v8544_v5, 4 }
  0xd6   : > { %5511 = vmatmul.mubr.msk.bf16.gmra.mrb[28].mxu1 %vm715_vm3, %v4894_v51  ;;  %5665 = vmatmul.mubr.msk.bf16.gmra.mrb[12].mxu0 %vm715_vm3, %v5179_v35  ;;  %v1284_v51 = vrot.slane %v6143_v42, 5  ;;  %v8541_v35 = vcombine.low %v7171_v4, %v7176_v22  ;;  %v3512_v42 = vshll.u32 %v7047_v48, 16  ;;  %v6148_v4 = vld [vmem:[%s6422_s11 + $0x50] sm:$0x1]  ;;  %v6150_v22 = vld [vmem:[%s6422_s11 + $0x5c] sm:$0x1] }
  0xd7   : > { %5516 = vmatprep.mubr.msk.bf16.mxu1 %vm715_vm3, %v4928_v63  ;;  %v1287_v44 = vrot.slane %v6148_v4, 5  ;;  %v1294_v55 = vrot.slane %v6150_v22, 5  ;;  %v8542_v4 = vshrl.u32 %v7044_v40, 16  ;;  %v7373_v48 = vld [vmem:[%s6422_s11 + $0xd0] sm:$0xf] }
  0xd8   : > { %5668 = vmatprep.mubr.msk.bf16.mxu0 %vm715_vm3, %v8541_v35  ;;  %v1291_v35 = vrot.slane %v6146_v45, 5  ;;  %v1286_v45 = vrot.slane %v1284_v51, 4  ;;  %v7347_v60 = vsel %vm6714_vm7, %v4917_v15, %v1284_v51  ;;  %v7354_v22 = vrot.slane %v3512_v42, 5  ;;  %v7376_v51 = vld [vmem:[%s6422_s11 + $0x20] sm:$0x1] }
  0xd9   : > { %v3505_v50 = vrot.slane %v8542_v4, 4  ;;  %v8545_v4 = vcombine.low %v7203_v20, %v7207_v16  ;;  %8547 = vst [vmem:[#allocation18_spill] sm:$0xff] %v7376_v51  ;;  %v1305_v20 = vrot.slane %v6726_v38, 5  ;;  %v3536_v16 = vshll.u32 %v7063_v53, 16  ;;  %v6156_v15 = vld [vmem:[%s6422_s11 + $0x74] sm:$0x1] }
  0xda   : > { %v1293_v63 = vrot.slane %v1291_v35, 4  ;;  %v7370_v40 = vsel %vm6714_vm7, %v1286_v45, %v1287_v44  ;;  %v8548_v42 = vcombine.low %v7241_v24, %v7254_v23  ;;  %v7387_v5 = vsel %vm6714_vm7, %v4918_v30, %v1291_v35  ;;  %v6152_v44 = vld [vmem:[%s6422_s11 + $0x60] sm:$0xf]  ;;  %v6153_v24 = vld [vmem:[%s6422_s11 + $0x68] sm:$0x1] }
  0xdb   : > { %v4919_v45 = vrot.slane %v6152_v44, 9  ;;  %v8550_v38 = vshll.u32 %v7060_v10, 16  ;;  %v1300_v23 = vrot.slane %v1298_v31, 4  ;;  %v1301_v35 = vrot.slane %v6153_v24, 5  ;;  %v7414_v24 = vld [vmem:[%s6422_s11 + $0x2c] sm:$0x1] }
  0xdc   : > { %v7400_v30 = vsel %vm6714_vm7, %v1293_v63, %v1294_v55  ;;  %v1307_v63 = vrot.slane %v1305_v20, 4 }
  0xdd   : > { %v3532_v26 = vrot.slane %v8550_v38, 5  ;;  %v3522_v38 = vshll.u32 %v7376_v51, 16  ;;  %v1312_v51 = vrot.slane %v6749_v43, 5 }
  0xde   : > { %5517 = vmatmul.mubr.msk.bf16.vlgmr.msra.gmra.mrb[0].mxu1 %vm715_vm3, %v8545_v4  ;;  %5669 = vmatmul.mubr.msk.bf16.gmra.mrb[16].mxu0 %vm715_vm3, %v8546_v52  ;;  %v8549_v4 = vshrl.u32 %v7060_v10, 16  ;;  %v6154_v10 = vld [vmem:[%s8497_s1 + $0x8] sm:$0x3] }
  0xdf   : > { %5549 = vmatpush3.bf16.msra.mxu1 %v7229_v19  ;;  %5520 = vmatprep.mubr.msk.bf16.mxu1 %vm715_vm3, %v8548_v42  ;;  %v8551_v19 = vcombine.low %v7211_v17, %v7221_v0  ;;  %v3509_v42 = vor.u32 %v3508_v28, %v3505_v50  ;;  %v1308_v17 = vrot.slane %v6156_v15, 5  ;;  %v7416_v50 = vrot.slane %v3536_v16, 5 }
  0xe0   : > { %v3529_v52 = vrot.slane %v8549_v4, 4  ;;  %6015 = vmatprep.subr.msk.bf16.mxu1 %vm764_vm0, %v6154_v10  ;;  %v3519_v4 = vor.u32 %v3518_v9, %v7354_v22  ;;  %v8552_v28 = vshrl.u32 %v7063_v53, 16  ;;  %v4934_v10 = vcombine.low %v7347_v60, %v7370_v40  ;;  %v6162_v9 = vld [vmem:[%s6422_s11 + $0x90] sm:$0xf] }
  0xe1   : > { %5672 = vmatprep.mubr.msk.bf16.mxu0 %vm715_vm3, %v8551_v19  ;;  %v6155_v19 = vld [vmem:[%s6422_s11 + $0x6c] sm:$0xf]  ;;  %v7431_v15 = vsel %vm6714_vm7, %v1300_v23, %v1301_v35  ;;  %v7433_v53 = vrot.slane %v3509_v42, 4  ;;  %v3560_v16 = vshll.u32 %v7069_v6, 16  ;;  %v7438_v40 = vrot.slane %v3522_v38, 5 }
  0xe2   : > { %v4920_v55 = vrot.slane %v6155_v19, 9  ;;  %v3542_v25 = vrot.slane %v8552_v28, 4  ;;  %v3533_v44 = vor.u32 %v3532_v26, %v3529_v52  ;;  %v7427_v19 = vsel %vm6714_vm7, %v4919_v45, %v1298_v31  ;;  %v6157_v38 = vld [vmem:[%s6422_s11 + $0x78] sm:$0xf] }
  0xe3   : > { %v7436_v60 = vrot.slane %v3519_v4, 4  ;;  %v3546_v31 = vshll.u32 %v7414_v24, 16  ;;  %v8553_v26 = vcombine.low %v7276_v18, %v7284_v27  ;;  %v8554_v45 = vcombine.low %v7247_v8, %v7250_v21 }
  0xe4   : > { %v7442_v43 = vsel %vm6714_vm7, %v4920_v55, %v1305_v20  ;;  %v7455_v52 = vsel %vm6714_vm7, %v1307_v63, %v1308_v17  ;;  %v3543_v20 = vor.u32 %v3542_v25, %v7416_v50  ;;  %v8555_v23 = vshrl.u32 %v7066_v61, 16  ;;  %v6158_v63 = vld [vmem:[%s6422_s11 + $0x80] sm:$0x1] }
  0xe5   : > { %v8556_v42 = vshll.u32 %v7066_v61, 16  ;;  %v8557_v27 = vcombine.low %v7288_v29, %v7306_v57  ;;  %v8558_v18 = vcombine.low %v7259_v54, %v7264_v2  ;;  %v3534_v17 = vrot.slane %v3533_v44, 4  ;;  %v7550_v61 = vld [vmem:[%s6422_s11 + $0x50] sm:$0x1] }
  0xe6   : > { %5521 = vmatmul.mubr.msk.bf16.gmra.mrb[4].mxu1 %vm715_vm3, %v8553_v26  ;;  %5673 = vmatmul.mubr.msk.bf16.gmra.mrb[20].mxu0 %vm715_vm3, %v8554_v45  ;;  %v3553_v35 = vrot.slane %v8555_v23, 4  ;;  %v4921_v55 = vrot.slane %v6157_v38, 9  ;;  %v1314_v25 = vrot.slane %v1312_v51, 4  ;;  %v1315_v28 = vrot.slane %v6158_v63, 5  ;;  %v7473_v26 = vld [vmem:[%s6422_s11 + $0x38] sm:$0x1] }
  0xe7   : > { %v3556_v4 = vrot.slane %v8556_v42, 5  ;;  %5524 = vmatprep.mubr.msk.bf16.mxu1 %vm715_vm3, %v8557_v27  ;;  %5676 = vmatprep.mubr.msk.bf16.mxu0 %vm715_vm3, %v8558_v18  ;;  %8559 = vst [vmem:[#allocation19_spill] sm:$0xff] %v7473_v26  ;;  %v3515_v29 = vsel %vm6448_vm4, %v7433_v53, %v7354_v22  ;;  %v7481_v57 = vrot.slane %v3560_v16, 5  ;;  %v8560_v44 = vshrl.u32 %v7069_v6, 16 }
  0xe8   : > { %v3525_v23 = vsel %vm6448_vm4, %v7436_v60, %v7438_v40  ;;  %v7493_v27 = vsel %vm764_vm0, %v7084_v41, 0  ;;  %v3584_v22 = vshll.u32 %v7093_v58, 16  ;;  %v3544_v53 = vrot.slane %v3543_v20, 4 }
  0xe9   : > { %v3566_v45 = vrot.slane %v8560_v44, 4  ;;  %v3548_v16 = vrot.slane %v3546_v31, 5  ;;  %v3557_v6 = vor.u32 %v3556_v4, %v3553_v35  ;;  %v3570_v18 = vshll.u32 %v7473_v26, 16  ;;  %v6159_v31 = vld [vmem:[%s6422_s11 + $0x88] sm:$0xf] }
  0xea   : > { %v3539_v60 = vsel %vm6448_vm4, %v3534_v17, %v7416_v50  ;;  %v7502_v40 = vsel %vm6714_vm7, %v4921_v55, %v1312_v51  ;;  %v7506_v41 = vsel %vm6714_vm7, %v1314_v25, %v1315_v28  ;;  %v3608_v38 = vshll.u32 %v7100_v13, 16  ;;  %v6160_v44 = vld [vmem:[%s6422_s11 + $0x84] sm:$0xf] }
  0xeb   : > { %v3567_v20 = vor.u32 %v3566_v45, %v7481_v57  ;;  %v1319_v35 = vrot.slane %v6159_v31, 5  ;;  %v8561_v4 = vshrl.u32 %v7090_v49, 16  ;;  %v8562_v50 = vshll.u32 %v7090_v49, 16  ;;  %v7517_v55 = vld [vmem:[%s6422_s11 + $0x44] sm:$0x1] }
  0xec   : > { %v4922_v51 = vrot.slane %v6160_v44, 9  ;;  %v7519_v42 = vrot.slane %v3584_v22, 5  ;;  %v8563_v25 = vshrl.u32 %v7093_v58, 16  ;;  %v1326_v45 = vrot.slane %v6808_v11, 5 }
  0xed   : > { %v3577_v63 = vrot.slane %v8561_v4, 4  ;;  %v3580_v17 = vrot.slane %v8562_v50, 5  ;;  %v8564_v31 = vcombine.low %v7332_v37, %v7336_v47  ;;  %v8565_v49 = vcombine.low %v7293_v14, %v7296_v3  ;;  %v6161_v50 = vld [vmem:[%s6422_s11 + $0x8c] sm:$0x1] }
  0xee   : > { %v3590_v28 = vrot.slane %v8563_v25, 4  ;;  %v3549_v22 = vsel %vm6448_vm4, %v3544_v53, %v3548_v16  ;;  %v3558_v4 = vrot.slane %v3557_v6, 4  ;;  %v3572_v58 = vrot.slane %v3570_v18, 5 }
  0xef   : > { %5525 = vmatmul.mubr.msk.bf16.gmra.mrb[8].mxu1 %vm715_vm3, %v8564_v31  ;;  %5677 = vmatmul.mubr.msk.bf16.gmra.mrb[24].mxu0 %vm715_vm3, %v8565_v49  ;;  %v1322_v44 = vrot.slane %v6161_v50, 5  ;;  %v8566_v11 = vcombine.low %v7320_v56, %v7328_v34  ;;  %v8567_v37 = vshrl.u32 %v7097_v46, 16  ;;  %v8568_v25 = vshll.u32 %v7097_v46, 16 }
  0xf0   : > { %5528 = vmatprep.mubr.msk.bf16.mxu1 %vm715_vm3, %v4934_v10  ;;  %v7544_v49 = vrot.slane %v3608_v38, 5  ;;  %v8569_v53 = vshrl.u32 %v7100_v13, 16  ;;  %v3568_v6 = vrot.slane %v3567_v20, 4  ;;  %v1321_v18 = vrot.slane %v1319_v35, 4 }
  0xf1   : > { %5680 = vmatprep.mubr.msk.bf16.mxu0 %vm715_vm3, %v8566_v11  ;;  %v3601_v47 = vrot.slane %v8567_v37, 4  ;;  %v3604_v31 = vrot.slane %v8568_v25, 5  ;;  %v3581_v50 = vor.u32 %v3580_v17, %v3577_v63  ;;  %v3594_v10 = vshll.u32 %v7517_v55, 16 }
  0xf2   : > { %v3614_v16 = vrot.slane %v8569_v53, 4  ;;  %v3591_v11 = vor.u32 %v3590_v28, %v7519_v42  ;;  %v4923_v26 = vrot.slane %v6162_v9, 9  ;;  %v1328_v37 = vrot.slane %v1326_v45, 4 }
  0xf3   : > { %v1329_v46 = vrot.slane %v6816_v62, 5  ;;  %v5205_v25 = vcombine.low %v3515_v29, %v3525_v23  ;;  %v5206_v38 = vcombine.low %v3539_v60, %v3549_v22  ;;  %v4938_v13 = vcombine.low %v7502_v40, %v7506_v41 }
  0xf4   : > { %v3632_v20 = vshll.u32 %v7128_v7, 16  ;;  %v7560_v63 = vsel %vm6714_vm7, %v4922_v51, %v1319_v35  ;;  %v3605_v17 = vor.u32 %v3604_v31, %v3601_v47  ;;  %v3615_v28 = vor.u32 %v3614_v16, %v7544_v49 }
  0xf5   : > { %v3618_v9 = vshll.u32 %v7550_v61, 16  ;;  %v3563_v62 = vsel %vm6448_vm4, %v3558_v4, %v7481_v57  ;;  %v3573_v29 = vsel %vm6448_vm4, %v3568_v6, %v3572_v58  ;;  %v7571_v23 = vsel %vm6714_vm7, %v1321_v18, %v1322_v44  ;;  %v7590_v4 = vld [vmem:[%s6422_s11 + $0x5c] sm:$0x1]  ;;  %v6163_v18 = vld [vmem:[%s6422_s11 + $0xa0] sm:$0xf] }
  0xf6   : > { %v3582_v60 = vrot.slane %v3581_v50, 4  ;;  %v3592_v40 = vrot.slane %v3591_v11, 4  ;;  %v3596_v41 = vrot.slane %v3594_v10, 5  ;;  %v7575_v35 = vsel %vm6714_vm7, %v4923_v26, %v1326_v45 }
  0xf7   : > { %v7579_v51 = vsel %vm6714_vm7, %v1328_v37, %v1329_v46  ;;  %v8570_v57 = vcombine.low %v7387_v5, %v7400_v30  ;;  %v8571_v22 = vcombine.low %v7352_v59, %v7373_v48  ;;  %v8572_v58 = vshrl.u32 %v7125_v39, 16  ;;  %v6164_v37 = vld [vmem:[%s6422_s11 + $0x9c] sm:$0xf] }
  0xf8   : > { %v8573_v45 = vshll.u32 %v7125_v39, 16  ;;  %v7596_v47 = vrot.slane %v3632_v20, 5  ;;  %v8574_v5 = vshrl.u32 %v7128_v7, 16  ;;  %v8575_v31 = vcombine.low %v7427_v19, %v7431_v15  ;;  %v6165_v20 = vld [vmem:[%s6422_s11 + $0xa4] sm:$0x1] }
  0xf9   : > { %5529 = vmatmul.mubr.msk.bf16.gmra.mrb[12].mxu1 %vm715_vm3, %v8570_v57  ;;  %5681 = vmatmul.mubr.msk.bf16.gmra.mrb[28].mxu0 %vm715_vm3, %v8571_v22  ;;  %v3625_v26 = vrot.slane %v8572_v58, 4  ;;  %v3606_v53 = vrot.slane %v3605_v17, 4  ;;  %v3616_v16 = vrot.slane %v3615_v28, 4  ;;  %v3620_v6 = vrot.slane %v3618_v9, 5  ;;  %v8577_v57 = vld [vmem:[#allocation11_spill] sm:$0xff] }
  0xfa   : > { %v3628_v44 = vrot.slane %v8573_v45, 5  ;;  %v3638_v30 = vrot.slane %v8574_v5, 4  ;;  %5532 = vmatprep.mubr.msk.bf16.mxu1 %vm715_vm3, %v8575_v31  ;;  %5686 = vmatprep.mubr.msk.bf16.mxu0 %vm715_vm3, %v5205_v25  ;;  %v1333_v39 = vrot.slane %v6163_v18, 5  ;;  %v5207_v50 = vcombine.low %v3563_v62, %v3573_v29 }
  0xfb   : > { %v4939_v10 = vcombine.low %v7560_v63, %v7571_v23  ;;  %v3587_v7 = vsel %vm6448_vm4, %v3582_v60, %v7519_v42  ;;  %v3656_v19 = vshll.u32 %v7142_v36, 16  ;;  %v3597_v15 = vsel %vm6448_vm4, %v3592_v40, %v3596_v41  ;;  %v8576_v40 = vld [vmem:[#allocation6_spill] sm:$0xff] }
  0xfc   : > { %v4940_v11 = vcombine.low %v7575_v35, %v7579_v51  ;;  %v4924_v46 = vrot.slane %v6164_v37, 9  ;;  %v3642_v25 = vshll.u32 %v7590_v4, 16  ;;  %v1336_v17 = vrot.slane %v6165_v20, 5 }
  0xfd   : > { %v3629_v28 = vor.u32 %v3628_v44, %v3625_v26  ;;  %v3639_v9 = vor.u32 %v3638_v30, %v7596_v47  ;;  %v1340_v42 = vrot.slane %v6859_v1, 5  ;;  %v3611_v62 = vsel %vm6448_vm4, %v3606_v53, %v7544_v49  ;;  %v7640_v53 = vld [vmem:[%s6422_s11 + $0x68] sm:$0x1] }
  0xfe   : > { %v3621_v29 = vsel %vm6448_vm4, %v3616_v16, %v3620_v6  ;;  %v1335_v60 = vrot.slane %v1333_v39, 4  ;;  %v4925_v41 = vrot.slane %v8576_v40, 9  ;;  %v8578_v22 = vshrl.u32 %v8577_v57, 16  ;;  %v8581_v16 = vld [vmem:[#allocation13_spill] sm:$0xff] }
  0xff   : > { %v8579_v45 = vshll.u32 %v8577_v57, 16  ;;  %v7631_v44 = vrot.slane %v3656_v19, 5  ;;  %v8580_v1 = vshrl.u32 %v7142_v36, 16  ;;  %v5208_v30 = vcombine.low %v3587_v7, %v3597_v15  ;;  %v8583_v7 = vld [vmem:[#allocation7_spill] sm:$0xff] }
 0x100   : > { %v3649_v58 = vrot.slane %v8578_v22, 4  ;;  %v7637_v49 = vsel %vm6714_vm7, %v4924_v46, %v1333_v39  ;;  %v3644_v31 = vrot.slane %v3642_v25, 5  ;;  %v3680_v6 = vshll.u32 %v8581_v16, 16 }
 0x101   : > { %v3652_v26 = vrot.slane %v8579_v45, 5  ;;  %v3662_v5 = vrot.slane %v8580_v1, 4  ;;  %v8582_v18 = vcombine.low %v7442_v43, %v7455_v52  ;;  %5687 = vmatmul.mubr.msk.bf16.vlgmr.msra.gmra.mrb[0].mxu0 %vm715_vm3, %v5206_v38  ;;  %v3630_v19 = vrot.slane %v3629_v28, 4  ;;  %v8584_v52 = vld [vmem:[#allocation15_spill] sm:$0xff]  ;;  %v8591_v1 = vld [vmem:[#allocation14_spill] sm:$0xff] }
 0x102   : > { %v3640_v36 = vrot.slane %v3639_v9, 4  ;;  %v1342_v37 = vrot.slane %v1340_v42, 4  ;;  %v1343_v15 = vrot.slane %v8583_v7, 5  ;;  %5719 = vmatpush3.bf16.msra.mxu0 %v7493_v27  ;;  %v5209_v39 = vcombine.low %v3611_v62, %v3621_v29  ;;  %5690 = vmatprep.mubr.msk.bf16.mxu0 %vm715_vm3, %v5207_v50  ;;  %v8586_v9 = vld [vmem:[#allocation12_spill] sm:$0xff] }
 0x103   : > { %5533 = vmatmul.mubr.msk.bf16.gmra.mrb[16].mxu1 %vm715_vm3, %v8582_v18  ;;  %v7653_v46 = vsel %vm6714_vm7, %v1335_v60, %v1336_v17  ;;  %v7657_v43 = vsel %vm6714_vm7, %v4925_v41, %v1340_v42  ;;  %v3704_v38 = vshll.u32 %v8584_v52, 16  ;;  %v3653_v25 = vor.u32 %v3652_v26, %v3649_v58  ;;  %v8590_v58 = vld [vmem:[#allocation8_spill] sm:$0xff]  ;;  %v7683_v26 = vld [vmem:[%s6422_s11 + $0x74] sm:$0x1] }
 0x104   : > { %5536 = vmatprep.mubr.msk.bf16.mxu1 %vm715_vm3, %v4938_v13  ;;  %v3663_v20 = vor.u32 %v3662_v5, %v7631_v44  ;;  %v3666_v27 = vshll.u32 %v7640_v53, 16  ;;  %v8585_v13 = vld [vmem:[#allocation9_spill] sm:$0xff]  ;;  %v8587_v62 = vshrl.u32 %v8586_v9, 16  ;;  %v8588_v29 = vshll.u32 %v8586_v9, 16  ;;  %v7695_v9 = vld [vmem:[%s6422_s11 + $0x80] sm:$0x1] }
 0x105   : > { %v1347_v28 = vrot.slane %v8585_v13, 5  ;;  %v7668_v42 = vrot.slane %v3680_v6, 5  ;;  %v8589_v40 = vshrl.u32 %v8581_v16, 16  ;;  %v3635_v50 = vsel %vm6448_vm4, %v3630_v19, %v7596_v47 }
 0x106   : > { %v3673_v17 = vrot.slane %v8587_v62, 4  ;;  %v3676_v60 = vrot.slane %v8588_v29, 5  ;;  %v3645_v57 = vsel %vm6448_vm4, %v3640_v36, %v3644_v31  ;;  %v7679_v22 = vsel %vm6714_vm7, %v1342_v37, %v1343_v15  ;;  %v8595_v37 = vld [vmem:[#allocation10_spill] sm:$0xff] }
 0x107   : > { %v3686_v41 = vrot.slane %v8589_v40, 4  ;;  %v4926_v45 = vrot.slane %v8590_v58, 9  ;;  %v8592_v5 = vshrl.u32 %v8591_v1, 16  ;;  %v8593_v16 = vshll.u32 %v8591_v1, 16 }
 0x108   : > { %v7689_v7 = vrot.slane %v3704_v38, 5  ;;  %v8594_v47 = vshrl.u32 %v8584_v52, 16  ;;  %v3654_v31 = vrot.slane %v3653_v25, 4  ;;  %v3664_v36 = vrot.slane %v3663_v20, 4 }
 0x109   : > { %v3697_v6 = vrot.slane %v8592_v5, 4  ;;  %v3700_v18 = vrot.slane %v8593_v16, 5  ;;  %v3668_v13 = vrot.slane %v3666_v27, 5  ;;  %v1350_v15 = vrot.slane %v8595_v37, 5  ;;  %5691 = vmatmul.mubr.msk.bf16.gmra.mrb[4].mxu0 %vm715_vm3, %v5208_v30  ;;  %v8596_v27 = vld [vmem:[#allocation16_spill] sm:$0xff] }
 0x10a   : > { %v3710_v19 = vrot.slane %v8594_v47, 4  ;;  %v1349_v62 = vrot.slane %v1347_v28, 4  ;;  %v3677_v29 = vor.u32 %v3676_v60, %v3673_v17  ;;  %v3687_v40 = vor.u32 %v3686_v41, %v7668_v42  ;;  %5694 = vmatprep.mubr.msk.bf16.mxu0 %vm715_vm3, %v5209_v39  ;;  %v7740_v16 = vld [vmem:[%s6422_s11 + $0x8c] sm:$0x1] }
 0x10b   : > { %v3690_v58 = vshll.u32 %v7683_v26, 16  ;;  %v3818_v1 = vshll.u32 %v7293_v14, 16  ;;  %5537 = vmatmul.mubr.msk.bf16.gmra.mrb[20].mxu1 %vm715_vm3, %v4939_v10  ;;  %v4941_v52 = vcombine.low %v7637_v49, %v7653_v46  ;;  %v4942_v38 = vcombine.low %v7657_v43, %v7679_v22 }
 0x10c   : > { %v3728_v25 = vshll.u32 %v7197_v33, 16  ;;  %5540 = vmatprep.mubr.msk.bf16.mxu1 %vm715_vm3, %v4940_v11  ;;  %v5210_v63 = vcombine.low %v3635_v50, %v3645_v57  ;;  %v3701_v23 = vor.u32 %v3700_v18, %v3697_v6  ;;  %v3711_v10 = vor.u32 %v3710_v19, %v7689_v7  ;;  %v8600_v18 = vld [vmem:[#allocation17_spill] sm:$0xff] }
 0x10d   : > { %v3714_v30 = vshll.u32 %v7695_v9, 16  ;;  %v3659_v49 = vsel %vm6448_vm4, %v3654_v31, %v7631_v44  ;;  %v3669_v46 = vsel %vm6448_vm4, %v3664_v36, %v3668_v13  ;;  %v7724_v35 = vsel %vm6714_vm7, %v4926_v45, %v1347_v28 }
 0x10e   : > { %v3752_v51 = vshll.u32 %v7221_v0, 16  ;;  %v7729_v11 = vsel %vm6714_vm7, %v1349_v62, %v1350_v15  ;;  %v3678_v39 = vrot.slane %v3677_v29, 4  ;;  %v3688_v43 = vrot.slane %v3687_v40, 4  ;;  %v7757_v40 = vld [vmem:[%s6422_s11 + $0x98] sm:$0x1] }
 0x10f   : > { %v3692_v20 = vrot.slane %v3690_v58, 5  ;;  %v8597_v17 = vshrl.u32 %v8596_v27, 16  ;;  %v8598_v60 = vshll.u32 %v8596_v27, 16  ;;  %v7735_v50 = vrot.slane %v3728_v25, 5  ;;  %v6166_v25 = vld [vmem:[%s6422_s11 + $0xc] sm:$0xf] }
 0x110   : > { %v8599_v28 = vshrl.u32 %v7197_v33, 16  ;;  %v5211_v22 = vcombine.low %v3659_v49, %v3669_v46  ;;  %v3702_v45 = vrot.slane %v3701_v23, 4  ;;  %v3712_v5 = vrot.slane %v3711_v10, 4 }
 0x111   : > { %v3721_v44 = vrot.slane %v8597_v17, 4  ;;  %v3724_v41 = vrot.slane %v8598_v60, 5  ;;  %v3716_v6 = vrot.slane %v3714_v30, 5  ;;  %v8601_v47 = vshrl.u32 %v8600_v18, 16  ;;  %5695 = vmatmul.mubr.msk.bf16.gmra.mrb[8].mxu0 %vm715_vm3, %v5210_v63 }
 0x112   : > { %v3734_v57 = vrot.slane %v8599_v28, 4  ;;  %v8602_v31 = vshll.u32 %v8600_v18, 16  ;;  %v7746_v13 = vrot.slane %v3752_v51, 5  ;;  %v8603_v37 = vshrl.u32 %v7221_v0, 16  ;;  %v6167_v0 = vld [vmem:[%s6422_s11 + $0x10] sm:$0xf]  ;;  %5698 = vmatprep.mubr.msk.bf16.mxu0 %vm715_vm3, %v5211_v22 }
 0x113   : > { %v3745_v19 = vrot.slane %v8601_v47, 4  ;;  %v3828_v15 = vshrl.u32 %v7296_v3, 16  ;;  %v3683_v62 = vsel %vm6448_vm4, %v3678_v39, %v7668_v42  ;;  %v3693_v29 = vsel %vm6448_vm4, %v3688_v43, %v3692_v20  ;;  %5541 = vmatmul.mubr.msk.bf16.gmra.mrb[24].mxu1 %vm715_vm3, %v4941_v52  ;;  %v7787_v22 = vld [vmem:[%s6422_s11 + $0xa4] sm:$0x1] }
 0x114   : > { %v3748_v36 = vrot.slane %v8602_v31, 5  ;;  %v3758_v33 = vrot.slane %v8603_v37, 4  ;;  %v3776_v58 = vshll.u32 %v7250_v21, 16  ;;  %v5009_v23 = vcombine.low %v6166_v25, %v6167_v0  ;;  %5544 = vmatprep.mubr.msk.bf16.mxu1 %vm715_vm3, %v4942_v38 }
 0x115   : > { %v3725_v10 = vor.u32 %v3724_v41, %v3721_v44  ;;  %v3735_v30 = vor.u32 %v3734_v57, %v7735_v50  ;;  %v3738_v49 = vshll.u32 %v7740_v16, 16  ;;  %v4943_v42 = vcombine.low %v7724_v35, %v7729_v11 }
 0x116   : > { %v3707_v52 = vsel %vm6448_vm4, %v3702_v45, %v7689_v7  ;;  %v3717_v63 = vsel %vm6448_vm4, %v3712_v5, %v3716_v6  ;;  %v3800_v46 = vshll.u32 %v7264_v2, 16  ;;  %v5212_v51 = vcombine.low %v3683_v62, %v3693_v29 }
 0x117   : > { %v3749_v39 = vor.u32 %v3748_v36, %v3745_v19  ;;  %v3759_v43 = vor.u32 %v3758_v33, %v7746_v13  ;;  %v3762_v38 = vshll.u32 %v7757_v40, 16  ;;  %v8604_v20 = vshrl.u32 %v7247_v8, 16  ;;  %v7799_v33 = vld [vmem:[%s6422_s11 + $0xb0] sm:$0x1] }
 0x118   : > { %v8605_v35 = vshll.u32 %v7247_v8, 16  ;;  %v7782_v17 = vrot.slane %v3776_v58, 5  ;;  %v8606_v7 = vshrl.u32 %v7250_v21, 16  ;;  %v5213_v60 = vcombine.low %v3707_v52, %v3717_v63 }
 0x119   : > { %v3769_v27 = vrot.slane %v8604_v20, 4  ;;  %v3726_v41 = vrot.slane %v3725_v10, 4  ;;  %v3736_v28 = vrot.slane %v3735_v30, 4  ;;  %v3740_v57 = vrot.slane %v3738_v49, 5  ;;  %5699 = vmatmul.mubr.msk.bf16.gmra.mrb[12].mxu0 %vm715_vm3, %v5212_v51  ;;  %v6168_v10 = vld [vmem:[%s6422_s11 + $0x18] sm:$0xf] }
 0x11a   : > { %v3772_v11 = vrot.slane %v8605_v35, 5  ;;  %v3782_v44 = vrot.slane %v8606_v7, 4  ;;  %v8607_v45 = vshrl.u32 %v7259_v54, 16  ;;  %v8608_v6 = vshll.u32 %v7259_v54, 16  ;;  %5702 = vmatprep.mubr.msk.bf16.mxu0 %vm715_vm3, %v5213_v60  ;;  %v6169_v30 = vld [vmem:[%s6422_s11 + $0x1c] sm:$0xf] }
 0x11b   : > { %v7793_v8 = vrot.slane %v3800_v46, 5  ;;  %v8609_v47 = vshrl.u32 %v7264_v2, 16  ;;  %v3839_v21 = vshrl.u32 %v7320_v56, 16  ;;  %v3750_v31 = vrot.slane %v3749_v39, 4  ;;  %5545 = vmatmul.mubr.msk.bf16.gmra.mrb[28].mxu1 %vm715_vm3, %v4943_v42  ;;  %v6170_v46 = vld [vmem:[%s6422_s11 + $0x24] sm:$0xf] }
 0x11c   : > { %v3793_v5 = vrot.slane %v8607_v45, 4  ;;  %v3796_v18 = vrot.slane %v8608_v6, 5  ;;  %v3760_v36 = vrot.slane %v3759_v43, 4  ;;  %v3764_v37 = vrot.slane %v3762_v38, 5  ;;  %5550 = vmatprep.mubr.msk.bf16.mxu1 %vm715_vm3, %v5009_v23 }
 0x11d   : > { %v3806_v19 = vrot.slane %v8609_v47, 4  ;;  %v3842_v62 = vshll.u32 %v7320_v56, 16  ;;  %v3773_v29 = vor.u32 %v3772_v11, %v3769_v27  ;;  %v3783_v54 = vor.u32 %v3782_v44, %v7782_v17  ;;  %v7828_v11 = vld [vmem:[%s6422_s11 + $0xbc] sm:$0x1] }
 0x11e   : > { %v3786_v58 = vshll.u32 %v7787_v22, 16  ;;  %v3852_v2 = vshrl.u32 %v7328_v34, 16  ;;  %v3731_v25 = vsel %vm6448_vm4, %v3726_v41, %v7735_v50  ;;  %v3741_v56 = vsel %vm6448_vm4, %v3736_v28, %v3740_v57  ;;  %v6171_v50 = vld [vmem:[%s6422_s11 + $0x28] sm:$0xf] }
 0x11f   : > { %v3824_v0 = vshll.u32 %v7296_v3, 16  ;;  %v5010_v49 = vcombine.low %v6168_v10, %v6169_v30  ;;  %v3797_v42 = vor.u32 %v3796_v18, %v3793_v5  ;;  %v3807_v52 = vor.u32 %v3806_v19, %v7793_v8 }
 0x120   : > { %v3810_v63 = vshll.u32 %v7799_v33, 16  ;;  %v5011_v51 = vcombine.low %v6170_v46, %v6171_v50  ;;  %v3755_v39 = vsel %vm6448_vm4, %v3750_v31, %v7746_v13  ;;  %v3765_v23 = vsel %vm6448_vm4, %v3760_v36, %v3764_v37  ;;  %v7846_v31 = vld [vmem:[%s6422_s11 + $0xc8] sm:$0x1]  ;;  %v8611_v37 = vld [vmem:[#allocation5_spill] sm:$0xff] }
 0x121   : > { %v3848_v43 = vshll.u32 %v7328_v34, 16  ;;  %v5214_v38 = vcombine.low %v3731_v25, %v3741_v56  ;;  %v3774_v20 = vrot.slane %v3773_v29, 4  ;;  %v3784_v27 = vrot.slane %v3783_v54, 4  ;;  %v6172_v25 = vld [vmem:[%s6422_s11 + $0x30] sm:$0xf] }
 0x122   : > { %v3788_v35 = vrot.slane %v3786_v58, 5  ;;  %v8610_v7 = vshrl.u32 %v7293_v14, 16  ;;  %v3820_v60 = vrot.slane %v3818_v1, 5  ;;  %v7834_v41 = vrot.slane %v3824_v0, 5  ;;  %v6173_v56 = vld [vmem:[%s6422_s11 + $0x34] sm:$0xf] }
 0x123   : > { %v3830_v13 = vrot.slane %v3828_v15, 4  ;;  %v5215_v28 = vcombine.low %v3755_v39, %v3765_v23  ;;  %v3798_v34 = vrot.slane %v3797_v42, 4  ;;  %v3808_v57 = vrot.slane %v3807_v52, 4  ;;  %5551 = vmatmul.mubr.msk.bf16.vlgmr.msra.gmra.mrb[0].mxu1 %vm715_vm3, %v5010_v49  ;;  %5703 = vmatmul.mubr.msk.bf16.gmra.mrb[16].mxu0 %vm715_vm3, %v5214_v38  ;;  %v6174_v52 = vld [vmem:[%s6422_s11 + $0x3c] sm:$0xf] }
 0x124   : > { %v3817_v44 = vrot.slane %v8610_v7, 4  ;;  %v3812_v45 = vrot.slane %v3810_v63, 5  ;;  %v3841_v5 = vrot.slane %v3839_v21, 4  ;;  %v3844_v6 = vrot.slane %v3842_v62, 5  ;;  %5753 = vmatpush3.bf16.msra.mxu1 %v8611_v37  ;;  %5554 = vmatprep.mubr.msk.bf16.mxu1 %vm715_vm3, %v5011_v51  ;;  %v6175_v63 = vld [vmem:[%s6422_s11 + $0x40] sm:$0xf] }
 0x125   : > { %v7838_v18 = vrot.slane %v3848_v43, 5  ;;  %v3854_v47 = vrot.slane %v3852_v2, 4  ;;  %v3863_v19 = vshrl.u32 %v7352_v59, 16  ;;  %v3779_v14 = vsel %vm6448_vm4, %v3774_v20, %v7782_v17  ;;  %5706 = vmatprep.mubr.msk.bf16.mxu0 %vm715_vm3, %v5215_v28  ;;  %v7873_v20 = vld [vmem:[%s6422_s11 + $0xd4] sm:$0x1] }
 0x126   : > { %v3834_v1 = vshll.u32 %v7828_v11, 16  ;;  %v3866_v3 = vshll.u32 %v7352_v59, 16  ;;  %v3789_v15 = vsel %vm6448_vm4, %v3784_v27, %v3788_v35  ;;  %v3821_v21 = vor.u32 %v3820_v60, %v3817_v44  ;;  %v6176_v44 = vld [vmem:[%s6422_s11 + $0x1c] sm:$0xf] }
 0x127   : > { %v3831_v36 = vor.u32 %v3830_v13, %v7834_v41  ;;  %v3876_v17 = vshrl.u32 %v7373_v48, 16  ;;  %v3803_v59 = vsel %vm6448_vm4, %v3798_v34, %v7793_v8  ;;  %v3872_v62 = vshll.u32 %v7373_v48, 16  ;;  %v7884_v13 = vld [vmem:[%s6422_s11 + $0x78] sm:$0xf] }
 0x128   : > { %v3813_v29 = vsel %vm6448_vm4, %v3808_v57, %v3812_v45  ;;  %v3845_v54 = vor.u32 %v3844_v6, %v3841_v5  ;;  %v3855_v58 = vor.u32 %v3854_v47, %v7838_v18  ;;  %v3858_v2 = vshll.u32 %v7846_v31, 16  ;;  %v7893_v45 = vld [vmem:[%s6422_s11 + $0x7c] sm:$0xf] }
 0x129   : > { %v5012_v0 = vcombine.low %v6172_v25, %v6173_v56  ;;  %v5216_v10 = vcombine.low %v3779_v14, %v3789_v15  ;;  %v3836_v8 = vrot.slane %v3834_v1, 5  ;;  %v3822_v30 = vrot.slane %v3821_v21, 4  ;;  %v6180_v14 = vld [vmem:[%s6422_s11 + $0x4c] sm:$0xf]  ;;  %v6181_v15 = vld [vmem:[%s6422_s11 + $0x54] sm:$0xf] }
 0x12a   : > { %v3832_v49 = vrot.slane %v3831_v36, 4  ;;  %v3865_v48 = vrot.slane %v3863_v19, 4  ;;  %v3868_v42 = vrot.slane %v3866_v3, 5  ;;  %v5013_v46 = vcombine.low %v6174_v52, %v6175_v63  ;;  %v6179_v19 = vld [vmem:[%s6422_s11 + $0x48] sm:$0xf] }
 0x12b   : > { %v5217_v50 = vcombine.low %v3803_v59, %v3813_v29  ;;  %v7870_v51 = vrot.slane %v3872_v62, 5  ;;  %v3878_v39 = vrot.slane %v3876_v17, 4  ;;  %v3846_v23 = vrot.slane %v3845_v54, 4  ;;  %5555 = vmatmul.mubr.msk.bf16.gmra.mrb[4].mxu1 %vm715_vm3, %v5012_v0  ;;  %5707 = vmatmul.mubr.msk.bf16.gmra.mrb[20].mxu0 %vm715_vm3, %v5216_v10  ;;  %v6182_v21 = vld [vmem:[%s6422_s11 + $0x58] sm:$0xf] }
 0x12c   : > { %v3856_v43 = vrot.slane %v3855_v58, 4  ;;  %v3860_v38 = vrot.slane %v3858_v2, 5  ;;  %v3827_v27 = vsel %vm6448_vm4, %v3822_v30, %v7834_v41  ;;  %v3837_v35 = vsel %vm6448_vm4, %v3832_v49, %v3836_v8  ;;  %5558 = vmatprep.mubr.msk.bf16.mxu1 %vm715_vm3, %v5013_v46  ;;  %v6183_v17 = vld [vmem:[%s6422_s11 + $0x28] sm:$0xf]  ;;  %v6184_v62 = vld [vmem:[%s6422_s11 + $0x18] sm:$0xf] }
 0x12d   : > { %v3869_v7 = vor.u32 %v3868_v42, %v3865_v48  ;;  %v4198_v60 = vrot.slane %v6176_v44, 5  ;;  %v2241_v28 = vshrl.u32 %v7884_v13, 16  ;;  %5710 = vmatprep.mubr.msk.bf16.mxu0 %vm715_vm3, %v5217_v50  ;;  %v3879_v41 = vor.u32 %v3878_v39, %v7870_v51  ;;  %v8612_v58 = vld [vmem:[#allocation18_spill] sm:$0xff]  ;;  %v6185_v0 = vld [vmem:[%s6422_s11 + $0x34] sm:$0xf] }
 0x12e   : > { %v3882_v34 = vshll.u32 %v7873_v20, 16  ;;  %v2244_v57 = vshll.u32 %v7884_v13, 16  ;;  %v2250_v5 = vshll.u32 %v7893_v45, 16  ;;  %v3851_v6 = vsel %vm6448_vm4, %v3846_v23, %v7838_v18  ;;  %v6186_v42 = vld [vmem:[%s6422_s11 + $0x24] sm:$0xf] }
 0x12f   : > { %v3861_v47 = vsel %vm6448_vm4, %v3856_v43, %v3860_v38  ;;  %v5014_v1 = vcombine.low %v6179_v19, %v6180_v14  ;;  %v5218_v3 = vcombine.low %v3827_v27, %v3837_v35  ;;  %v5015_v36 = vcombine.low %v6181_v15, %v6182_v21  ;;  %v6187_v43 = vld [vmem:[%s6422_s11 + $0x30] sm:$0xf]  ;;  %v7958_v15 = vld [vmem:[%s6422_s11 + $0x84] sm:$0xf]  ;;  %v7961_v21 = vld [vmem:[%s6422_s11 + $0x88] sm:$0xf] }
 0x130   : > { %v4205_v37 = vrot.slane %v6183_v17, 5  ;;  %v3870_v59 = vrot.slane %v3869_v7, 4  ;;  %v5237_v29 = vrot.slane %v6184_v62, 9  ;;  %v4200_v54 = vrot.slane %v4198_v60, 4  ;;  %v6188_v7 = vld [vmem:[%s6422_s11 + $0x40] sm:$0xf] }
 0x131   : > { %v4201_v18 = vrot.slane %v8612_v58, 5  ;;  %v5219_v2 = vcombine.low %v3851_v6, %v3861_v47  ;;  %v3880_v25 = vrot.slane %v3879_v41, 4  ;;  %v3884_v56 = vrot.slane %v3882_v34, 5  ;;  %v6190_v34 = vld [vmem:[%s6422_s11 + $0x60] sm:$0xf] }
 0x132   : > { %v4212_v10 = vrot.slane %v6185_v0, 5  ;;  %v7909_v8 = vrot.slane %v2241_v28, 4  ;;  %v7911_v30 = vrot.slane %v2244_v57, 5  ;;  %v2254_v49 = vshrl.u32 %v7893_v45, 16  ;;  %v7937_v28 = vld [vmem:[%s6422_s11 + $0x80] sm:$0x1] }
 0x133   : > { %v7914_v48 = vrot.slane %v2250_v5, 5  ;;  %v5238_v52 = vrot.slane %v6186_v42, 9  ;;  %v4207_v63 = vrot.slane %v4205_v37, 4  ;;  %v4208_v46 = vrot.slane %v7414_v24, 5  ;;  %5559 = vmatmul.mubr.msk.bf16.gmra.mrb[8].mxu1 %vm715_vm3, %v5014_v1  ;;  %5711 = vmatmul.mubr.msk.bf16.gmra.mrb[24].mxu0 %vm715_vm3, %v5218_v3  ;;  %v6191_v57 = vld [vmem:[%s6422_s11 + $0x64] sm:$0xf] }
 0x134   : > { %v3875_v50 = vsel %vm6448_vm4, %v3870_v59, %v7870_v51  ;;  %v4199_v39 = vsel %vm6714_vm7, %v5237_v29, %v4198_v60  ;;  %v4202_v23 = vsel %vm6714_vm7, %v4200_v54, %v4201_v18  ;;  %v5239_v24 = vrot.slane %v6187_v43, 9  ;;  %5562 = vmatprep.mubr.msk.bf16.mxu1 %vm715_vm3, %v5015_v36  ;;  %5714 = vmatprep.mubr.msk.bf16.mxu0 %vm715_vm3, %v5219_v2  ;;  %v8613_v51 = vld [vmem:[#allocation19_spill] sm:$0xff]  ;;  %v6192_v6 = vld [vmem:[%s6422_s11 + $0x6c] sm:$0xf]  ;;  %v7944_v47 = vld [vmem:[%s6422_s11 + $0x70] sm:$0xf] }
 0x135   : > { %v3885_v38 = vsel %vm6448_vm4, %v3880_v25, %v3884_v56  ;;  %v4214_v27 = vrot.slane %v4212_v10, 4  ;;  %v4215_v35 = vrot.slane %v8613_v51, 5  ;;  %v4219_v44 = vrot.slane %v6188_v7, 5  ;;  %v6196_v62 = vld [vmem:[%s6422_s11 + $0x3c] sm:$0xf] }
 0x136   : > { %v7934_v60 = vrot.slane %v2254_v49, 4  ;;  %v2260_v41 = vshll.u32 %v7937_v28, 16  ;;  %v5016_v5 = vcombine.low %v6190_v34, %v6191_v57  ;;  %v5017_v19 = vcombine.low %v6192_v6, %v7944_v47  ;;  %v7975_v58 = vld [vmem:[%s6422_s11 + $0x94] sm:$0xf]  ;;  %v7978_v18 = vld [vmem:[%s6422_s11 + $0x90] sm:$0xf] }
 0x137   : > { %v5018_v14 = vcombine.low %v7884_v13, %v7893_v45  ;;  %v7951_v1 = vsel %vm6714_vm7, %v5238_v52, %v4205_v37  ;;  %v7955_v3 = vsel %vm6714_vm7, %v4207_v63, %v4208_v46  ;;  %v5019_v36 = vcombine.low %v7958_v15, %v7961_v21  ;;  %v7987_v63 = vld [vmem:[%s6422_s11 + $0x9c] sm:$0xf]  ;;  %v7990_v46 = vld [vmem:[%s6422_s11 + $0xa0] sm:$0xf]  ;;  %v6203_v43 = vld [vmem:[%s6422_s11 + $0x58] sm:$0xf] }
 0x138   : > { %v5220_v17 = vcombine.low %v3875_v50, %v3885_v38  ;;  %v5254_v59 = vcombine.low %v4199_v39, %v4202_v23  ;;  %v7967_v37 = vsel %vm6714_vm7, %v5239_v24, %v4212_v10  ;;  %v5240_v29 = vrot.slane %v6196_v62, 9  ;;  %v6199_v10 = vld [vmem:[%s6422_s11 + $0x4c] sm:$0xf]  ;;  %v6202_v39 = vld [vmem:[%s6422_s11 + $0x48] sm:$0xf] }
 0x139   : > { %v7972_v54 = vsel %vm6714_vm7, %v4214_v27, %v4215_v35  ;;  %v5020_v2 = vcombine.low %v7978_v18, %v7975_v58  ;;  %v4221_v25 = vrot.slane %v4219_v44, 4  ;;  %v4222_v56 = vrot.slane %v7517_v55, 5  ;;  %v6204_v24 = vld [vmem:[%s6422_s11 + $0x64] sm:$0xf]  ;;  %v6205_v7 = vld [vmem:[%s6422_s11 + $0x70] sm:$0xf] }
 0x13a   : > { %v5255_v0 = vcombine.low %v7951_v1, %v7955_v3  ;;  %v4226_v49 = vrot.slane %v6199_v10, 5  ;;  %v2217_v42 = vshrl.u32 %v6192_v6, 16  ;;  %v2220_v52 = vshll.u32 %v6192_v6, 16  ;;  %v6207_v62 = vld [vmem:[%s6422_s11 + $0x60] sm:$0xf] }
 0x13b   : > { %v5021_v50 = vcombine.low %v7987_v63, %v7990_v46  ;;  %v5241_v23 = vrot.slane %v6202_v39, 9  ;;  %v4233_v55 = vrot.slane %v6203_v43, 5  ;;  %v4240_v38 = vrot.slane %v6204_v24, 5  ;;  %5563 = vmatmul.mubr.msk.bf16.gmra.mrb[12].mxu1 %vm715_vm3, %v5016_v5  ;;  %5715 = vmatmul.mubr.msk.bf16.gmra.mrb[28].mxu0 %vm715_vm3, %v5220_v17  ;;  %v6206_v5 = vld [vmem:[%s6422_s11 + $0x54] sm:$0xf] }
 0x13c   : > { %v5256_v27 = vcombine.low %v7967_v37, %v7972_v54  ;;  %v8003_v51 = vsel %vm6714_vm7, %v5240_v29, %v4219_v44  ;;  %v4229_v35 = vrot.slane %v7550_v61, 5  ;;  %v4247_v34 = vrot.slane %v6205_v7, 5  ;;  %5566 = vmatprep.mubr.msk.bf16.mxu1 %vm715_vm3, %v5017_v19  ;;  %5720 = vmatprep.mubr.msk.bf16.mxu0 %vm715_vm3, %v5254_v59  ;;  %v6210_v10 = vld [vmem:[%s6422_s11 + $0x6c] sm:$0xf]  ;;  %v8090_v45 = vld [vmem:[%s6422_s11 + $0xc4] sm:$0xf] }
 0x13d   : > { %v8011_v57 = vsel %vm6714_vm7, %v4221_v25, %v4222_v56  ;;  %v5242_v6 = vrot.slane %v6206_v5, 9  ;;  %v2226_v44 = vshll.u32 %v7944_v47, 16  ;;  %v2230_v1 = vshrl.u32 %v7944_v47, 16  ;;  %v8020_v25 = vld [vmem:[%s6422_s11 + $0xac] sm:$0xf] }
 0x13e   : > { %v4228_v61 = vrot.slane %v4226_v49, 4  ;;  %v4236_v3 = vrot.slane %v7590_v4, 5  ;;  %v2219_v17 = vrot.slane %v2217_v42, 4  ;;  %v2222_v19 = vrot.slane %v2220_v52, 5  ;;  %v8023_v56 = vld [vmem:[%s6422_s11 + $0xa8] sm:$0xf] }
 0x13f   : > { %v4235_v37 = vrot.slane %v4233_v55, 4  ;;  %v5243_v59 = vrot.slane %v6207_v62, 9  ;;  %v4242_v29 = vrot.slane %v4240_v38, 4  ;;  %v4243_v54 = vrot.slane %v7640_v53, 5  ;;  %v8047_v62 = vld [vmem:[%s6422_s11 + $0xb4] sm:$0xf] }
 0x140   : > { %v5022_v47 = vcombine.low %v8023_v56, %v8020_v25  ;;  %v5244_v39 = vrot.slane %v6210_v10, 9  ;;  %v4249_v4 = vrot.slane %v4247_v34, 4  ;;  %v4250_v42 = vrot.slane %v7683_v26, 5  ;;  %v8044_v26 = vld [vmem:[%s6422_s11 + $0xb8] sm:$0xf] }
 0x141   : > { %v5257_v52 = vcombine.low %v8003_v51, %v8011_v57  ;;  %v8033_v43 = vsel %vm6714_vm7, %v5241_v23, %v4226_v49  ;;  %v8035_v53 = vrot.slane %v2226_v44, 5  ;;  %v2232_v24 = vrot.slane %v2230_v1, 4  ;;  %v6213_v57 = vld [vmem:[%s6422_s11 + $0x7c] sm:$0xf]  ;;  %v6214_v1 = vld [vmem:[%s6422_s11 + $0x74] sm:$0x1] }
 0x142   : > { %v4230_v7 = vsel %vm6714_vm7, %v4228_v61, %v4229_v35  ;;  %v8041_v5 = vsel %vm6714_vm7, %v5242_v6, %v4233_v55  ;;  %v5023_v49 = vcombine.low %v8047_v62, %v8044_v26  ;;  %v2223_v23 = vor.u32 %v2222_v19, %v2219_v17 }
 0x143   : > { %v8053_v51 = vsel %vm6714_vm7, %v4235_v37, %v4236_v3  ;;  %v8057_v35 = vsel %vm6714_vm7, %v5243_v59, %v4240_v38  ;;  %v8061_v55 = vsel %vm6714_vm7, %v4242_v29, %v4243_v54  ;;  %v4254_v6 = vrot.slane %v6213_v57, 5  ;;  %5567 = vmatmul.mubr.msk.bf16.gmra.mrb[16].mxu1 %vm715_vm3, %v5018_v14  ;;  %5721 = vmatmul.mubr.msk.bf16.vlgmr.msra.gmra.mrb[0].mxu0 %vm715_vm3, %v5255_v0  ;;  %v6215_v3 = vld [vmem:[%s6422_s11 + $0x78] sm:$0xf]  ;;  %v8093_v14 = vld [vmem:[%s6422_s11 + $0xc0] sm:$0xf] }
 0x144   : > { %v8071_v44 = vsel %vm6714_vm7, %v5244_v39, %v4247_v34  ;;  %v8075_v38 = vsel %vm6714_vm7, %v4249_v4, %v4250_v42  ;;  %v2236_v61 = vshll.u32 %v6214_v1, 16  ;;  %v5245_v17 = vrot.slane %v6215_v3, 9  ;;  %5570 = vmatprep.mubr.msk.bf16.mxu1 %vm715_vm3, %v5019_v36  ;;  %5724 = vmatprep.mubr.msk.bf16.mxu0 %vm715_vm3, %v5256_v27  ;;  %v6218_v4 = vld [vmem:[%s6422_s11 + $0x84] sm:$0xf]  ;;  %v6219_v57 = vld [vmem:[%s6422_s11 + $0x88] sm:$0xf] }
 0x145   : > { %v8081_v19 = vrot.slane %v2260_v41, 5  ;;  %v5258_v13 = vcombine.low %v8033_v43, %v4230_v7  ;;  %v5024_v0 = vcombine.low %v8093_v14, %v8090_v45  ;;  %v2233_v28 = vor.u32 %v2232_v24, %v8035_v53  ;;  %v6220_v1 = vld [vmem:[%s6422_s11 + $0x94] sm:$0xf] }
 0x146   : > { %v5259_v41 = vcombine.low %v8041_v5, %v8053_v51  ;;  %v8100_v34 = vrot.slane %v2223_v23, 4  ;;  %v2247_v36 = vor.u32 %v7911_v30, %v7909_v8  ;;  %v2257_v27 = vor.u32 %v7934_v60, %v7914_v48 }
 0x147   : > { %v5260_v37 = vcombine.low %v8057_v35, %v8061_v55  ;;  %v5261_v59 = vcombine.low %v8071_v44, %v8075_v38  ;;  %v4256_v29 = vrot.slane %v4254_v6, 4  ;;  %v4257_v54 = vrot.slane %v7695_v9, 5 }
 0x148   : > { %v8111_v10 = vrot.slane %v2236_v61, 5  ;;  %v8115_v39 = vsel %vm6714_vm7, %v5245_v17, %v4254_v6  ;;  %v2265_v8 = vshrl.u32 %v7958_v15, 16  ;;  %v2268_v30 = vshll.u32 %v7958_v15, 16 }
 0x149   : > { %v8119_v60 = vrot.slane %v2233_v28, 4  ;;  %v5246_v42 = vrot.slane %v6218_v4, 9  ;;  %v2274_v43 = vshll.u32 %v7961_v21, 16  ;;  %v2278_v24 = vshrl.u32 %v7961_v21, 16 }
 0x14a   : > { %v2229_v9 = vsel %vm6448_vm4, %v8100_v34, %v8035_v53  ;;  %v8128_v7 = vrot.slane %v2247_v36, 4  ;;  %v8130_v23 = vrot.slane %v2257_v27, 4  ;;  %v4261_v6 = vrot.slane %v6219_v57, 5 }
 0x14b   : > { %v8135_v15 = vsel %vm6714_vm7, %v4256_v29, %v4257_v54  ;;  %v4268_v61 = vrot.slane %v6220_v1, 5  ;;  %v2289_v3 = vshrl.u32 %v7978_v18, 16  ;;  %v2292_v21 = vshll.u32 %v7978_v18, 16  ;;  %5571 = vmatmul.mubr.msk.bf16.gmra.mrb[20].mxu1 %vm715_vm3, %v5020_v2  ;;  %5725 = vmatmul.mubr.msk.bf16.gmra.mrb[4].mxu0 %vm715_vm3, %v5257_v52  ;;  %v6221_v54 = vld [vmem:[%s6422_s11 + $0x8c] sm:$0x1] }
 0x14c   : > { %v2267_v17 = vrot.slane %v2265_v8, 4  ;;  %v2270_v28 = vrot.slane %v2268_v30, 5  ;;  %v2298_v36 = vshll.u32 %v7975_v58, 16  ;;  %v2302_v27 = vshrl.u32 %v7975_v58, 16  ;;  %5574 = vmatprep.mubr.msk.bf16.mxu1 %vm715_vm3, %v5021_v50  ;;  %5728 = vmatprep.mubr.msk.bf16.mxu0 %vm715_vm3, %v5258_v13  ;;  %v6222_v30 = vld [vmem:[%s6422_s11 + $0x90] sm:$0xf] }
 0x14d   : > { %v2239_v18 = vsel %vm6448_vm4, %v8119_v60, %v8111_v10  ;;  %v4264_v2 = vrot.slane %v7740_v16, 5  ;;  %v8157_v52 = vrot.slane %v2274_v43, 5  ;;  %v2280_v29 = vrot.slane %v2278_v24, 4 }
 0x14e   : > { %v5262_v58 = vcombine.low %v8115_v39, %v8135_v15  ;;  %v2253_v50 = vsel %vm6448_vm4, %v8128_v7, %v7914_v48  ;;  %v4263_v13 = vrot.slane %v4261_v6, 4  ;;  %v2284_v8 = vshll.u32 %v6221_v54, 16 }
 0x14f   : > { %v5247_v4 = vrot.slane %v6222_v30, 9  ;;  %v4270_v10 = vrot.slane %v4268_v61, 4  ;;  %v2291_v60 = vrot.slane %v2289_v3, 4  ;;  %v2294_v16 = vrot.slane %v2292_v21, 5  ;;  %v6223_v3 = vld [vmem:[%s6422_s11 + $0xa0] sm:$0xf] }
 0x150   : > { %v2271_v43 = vor.u32 %v2270_v28, %v2267_v17  ;;  %v4271_v24 = vrot.slane %v7757_v40, 5  ;;  %v8168_v57 = vrot.slane %v2298_v36, 5  ;;  %v2304_v1 = vrot.slane %v2302_v27, 4 }
 0x151   : > { %v2263_v48 = vsel %vm6448_vm4, %v8130_v23, %v8081_v19  ;;  %v8176_v7 = vsel %vm6714_vm7, %v5246_v42, %v4261_v6  ;;  %v2281_v54 = vor.u32 %v2280_v29, %v8157_v52  ;;  %v4275_v21 = vrot.slane %v6223_v3, 5 }
 0x152   : > { %v8182_v40 = vsel %vm6714_vm7, %v4263_v13, %v4264_v2  ;;  %v2286_v17 = vrot.slane %v2284_v8, 5  ;;  %v2313_v28 = vshrl.u32 %v7987_v63, 16  ;;  %v2316_v36 = vshll.u32 %v7987_v63, 16  ;;  %v6224_v2 = vld [vmem:[%s6422_s11 + $0x98] sm:$0x1] }
 0x153   : > { %v8188_v19 = vsel %vm6714_vm7, %v5247_v4, %v4268_v61  ;;  %v2295_v42 = vor.u32 %v2294_v16, %v2291_v60  ;;  %v2322_v23 = vshll.u32 %v7990_v46, 16  ;;  %v2326_v6 = vshrl.u32 %v7990_v46, 16  ;;  %5575 = vmatmul.mubr.msk.bf16.gmra.mrb[24].mxu1 %vm715_vm3, %v5022_v47  ;;  %5729 = vmatmul.mubr.msk.bf16.gmra.mrb[8].mxu0 %vm715_vm3, %v5259_v41  ;;  %v6225_v47 = vld [vmem:[%s6422_s11 + $0x9c] sm:$0xf]  ;;  %v6226_v60 = vld [vmem:[%s6422_s11 + $0xac] sm:$0xf] }
 0x154   : > { %v2272_v63 = vrot.slane %v2271_v43, 4  ;;  %v8202_v61 = vsel %vm6714_vm7, %v4270_v10, %v4271_v24  ;;  %v2305_v27 = vor.u32 %v2304_v1, %v8168_v57  ;;  %v2308_v29 = vshll.u32 %v6224_v2, 16  ;;  %5578 = vmatprep.mubr.msk.bf16.mxu1 %vm715_vm3, %v5023_v49  ;;  %5732 = vmatprep.mubr.msk.bf16.mxu0 %vm715_vm3, %v5260_v37  ;;  %v6227_v43 = vld [vmem:[%s6422_s11 + $0xa4] sm:$0x1] }
 0x155   : > { %v2282_v46 = vrot.slane %v2281_v54, 4  ;;  %v5248_v5 = vrot.slane %v6225_v47, 9  ;;  %v4277_v51 = vrot.slane %v4275_v21, 4  ;;  %v4278_v41 = vrot.slane %v7787_v22, 5 }
 0x156   : > { %v5050_v13 = vcombine.low %v2229_v9, %v2239_v18  ;;  %v8221_v8 = vcombine.low %v2253_v50, %v2263_v48  ;;  %v2315_v49 = vrot.slane %v2313_v28, 4  ;;  %v2318_v35 = vrot.slane %v2316_v36, 5 }
 0x157   : > { %v5263_v55 = vcombine.low %v8176_v7, %v8182_v40  ;;  %v2296_v37 = vrot.slane %v2295_v42, 4  ;;  %v8225_v30 = vrot.slane %v2322_v23, 5  ;;  %v2328_v4 = vrot.slane %v2326_v6, 4 }
 0x158   : > { %v2277_v22 = vsel %vm6448_vm4, %v2272_v63, %v8157_v52  ;;  %v5264_v53 = vcombine.low %v8188_v19, %v8202_v61  ;;  %v2306_v34 = vrot.slane %v2305_v27, 4  ;;  %v2310_v9 = vrot.slane %v2308_v29, 5 }
 0x159   : > { %v2287_v18 = vsel %vm6448_vm4, %v2282_v46, %v2286_v17  ;;  %v8236_v50 = vsel %vm6714_vm7, %v5248_v5, %v4275_v21  ;;  %v8240_v10 = vsel %vm6714_vm7, %v4277_v51, %v4278_v41  ;;  %v4282_v16 = vrot.slane %v6226_v60, 5  ;;  %v6233_v60 = vld [vmem:[%s6422_s11 + $0xc4] sm:$0xf] }
 0x15a   : > { %v2319_v52 = vor.u32 %v2318_v35, %v2315_v49  ;;  %v2332_v24 = vshll.u32 %v6227_v43, 16  ;;  %v2337_v1 = vshrl.u32 %v8023_v56, 16  ;;  %v2340_v48 = vshll.u32 %v8023_v56, 16  ;;  %v6230_v35 = vld [vmem:[%s6422_s11 + $0xb4] sm:$0xf] }
 0x15b   : > { %v2301_v54 = vsel %vm6448_vm4, %v2296_v37, %v8168_v57  ;;  %v2329_v3 = vor.u32 %v2328_v4, %v8225_v30  ;;  %v2346_v21 = vshll.u32 %v8020_v25, 16  ;;  %v2350_v17 = vshrl.u32 %v8020_v25, 16  ;;  %5579 = vmatmul.mubr.msk.bf16.gmra.mrb[28].mxu1 %vm715_vm3, %v5024_v0  ;;  %5733 = vmatmul.mubr.msk.bf16.gmra.mrb[12].mxu0 %vm715_vm3, %v5261_v59  ;;  %v6228_v57 = vld [vmem:[%s6422_s11 + $0xa8] sm:$0xf] }
 0x15c   : > { %v2311_v56 = vsel %vm6448_vm4, %v2306_v34, %v2310_v9  ;;  %v5249_v28 = vrot.slane %v6228_v57, 9  ;;  %v2361_v36 = vshrl.u32 %v8047_v62, 16  ;;  %v2364_v42 = vshll.u32 %v8047_v62, 16  ;;  %5600 = vmatprep.mubr.msk.bf16.mxu1 %vm715_vm3, %v5050_v13  ;;  %5736 = vmatprep.mubr.msk.bf16.mxu0 %vm715_vm3, %v5262_v58  ;;  %v6229_v13 = vld [vmem:[%s6422_s11 + $0xb0] sm:$0x1] }
 0x15d   : > { %v4284_v25 = vrot.slane %v4282_v16, 4  ;;  %v4285_v44 = vrot.slane %v7799_v33, 5  ;;  %v2370_v38 = vshll.u32 %v8044_v26, 16  ;;  %v2374_v0 = vshrl.u32 %v8044_v26, 16  ;;  %v6231_v34 = vld [vmem:[%s6422_s11 + $0xb8] sm:$0xf] }
 0x15e   : > { %v5052_v59 = vcombine.low %v2277_v22, %v2287_v18  ;;  %v2320_v23 = vrot.slane %v2319_v52, 4  ;;  %v2339_v6 = vrot.slane %v2337_v1, 4  ;;  %v2342_v63 = vrot.slane %v2340_v48, 5  ;;  %v6232_v18 = vld [vmem:[%s6422_s11 + $0xbc] sm:$0x1] }
 0x15f   : > { %v2330_v62 = vrot.slane %v2329_v3, 4  ;;  %v2334_v27 = vrot.slane %v2332_v24, 5  ;;  %v8273_v2 = vrot.slane %v2346_v21, 5  ;;  %v2352_v39 = vrot.slane %v2350_v17, 4  ;;  %v6234_v17 = vld [vmem:[%s6422_s11 + $0xc0] sm:$0xf] }
 0x160   : > { %v5053_v15 = vcombine.low %v2301_v54, %v2311_v56  ;;  %v5265_v33 = vcombine.low %v8236_v50, %v8240_v10  ;;  %v2363_v58 = vrot.slane %v2361_v36, 4  ;;  %v2366_v29 = vrot.slane %v2364_v42, 5 }
 0x161   : > { %v4283_v26 = vsel %vm6714_vm7, %v5249_v28, %v4282_v16  ;;  %v4286_v46 = vsel %vm6714_vm7, %v4284_v25, %v4285_v44  ;;  %v8281_v47 = vrot.slane %v2370_v38, 5  ;;  %v2376_v5 = vrot.slane %v2374_v0, 4 }
 0x162   : > { %v2325_v51 = vsel %vm6448_vm4, %v2320_v23, %v8225_v30  ;;  %v2343_v41 = vor.u32 %v2342_v63, %v2339_v6  ;;  %v2356_v49 = vshll.u32 %v6229_v13, 16  ;;  %v5250_v37 = vrot.slane %v6230_v35, 9 }
 0x163   : > { %v2335_v4 = vsel %vm6448_vm4, %v2330_v62, %v2334_v27  ;;  %v2353_v22 = vor.u32 %v2352_v39, %v8273_v2  ;;  %v4289_v9 = vrot.slane %v6231_v34, 5  ;;  %v2380_v50 = vshll.u32 %v6232_v18, 16  ;;  %5601 = vmatmul.mubr.msk.bf16.vlgmr.msra.gmra.mrb[16].mxu1 %vm715_vm3, %v8221_v8  ;;  %5737 = vmatmul.mubr.msk.bf16.gmra.mrb[16].mxu0 %vm715_vm3, %v5263_v55  ;;  %v6236_v27 = vld [vmem:[%s6422_s11 + $0xd0] sm:$0xf] }
 0x164   : > { %v5266_v30 = vcombine.low %v4283_v26, %v4286_v46  ;;  %v2367_v10 = vor.u32 %v2366_v29, %v2363_v58  ;;  %v4296_v16 = vrot.slane %v6233_v60, 5  ;;  %v2385_v52 = vshrl.u32 %v8093_v14, 16  ;;  %5604 = vmatprep.mubr.msk.bf16.mxu1 %vm715_vm3, %v5052_v59  ;;  %5740 = vmatprep.mubr.msk.bf16.mxu0 %vm715_vm3, %v5264_v53  ;;  %v6235_v59 = vld [vmem:[%s6422_s11 + $0xc8] sm:$0x1]  ;;  %v6237_v26 = vld [vmem:[%s6422_s11 + $0xcc] sm:$0xf] }
 0x165   : > { %v2377_v8 = vor.u32 %v2376_v5, %v8281_v47  ;;  %v2388_v7 = vshll.u32 %v8093_v14, 16  ;;  %v2394_v40 = vshll.u32 %v8090_v45, 16  ;;  %v2398_v55 = vshrl.u32 %v8090_v45, 16 }
 0x166   : > { %v5054_v43 = vcombine.low %v2325_v51, %v2335_v4  ;;  %v2344_v24 = vrot.slane %v2343_v41, 4  ;;  %v2358_v1 = vrot.slane %v2356_v49, 5  ;;  %v4292_v48 = vrot.slane %v7828_v11, 5 }
 0x167   : > { %v2354_v54 = vrot.slane %v2353_v22, 4  ;;  %v4291_v3 = vrot.slane %v4289_v9, 4  ;;  %v2382_v21 = vrot.slane %v2380_v50, 5  ;;  %v5251_v19 = vrot.slane %v6234_v17, 9 }
 0x168   : > { %v2368_v61 = vrot.slane %v2367_v10, 4  ;;  %v4298_v53 = vrot.slane %v4296_v16, 4  ;;  %v4299_v56 = vrot.slane %v7846_v31, 5  ;;  %v2387_v14 = vrot.slane %v2385_v52, 4 }
 0x169   : > { %v2378_v57 = vrot.slane %v2377_v8, 4  ;;  %v2390_v28 = vrot.slane %v2388_v7, 5  ;;  %v2396_v36 = vrot.slane %v2394_v40, 5  ;;  %v2400_v45 = vrot.slane %v2398_v55, 4 }
 0x16a   : > { %v2349_v42 = vsel %vm6448_vm4, %v2344_v24, %v8273_v2  ;;  %v2359_v11 = vsel %vm6448_vm4, %v2354_v54, %v2358_v1  ;;  %v4290_v25 = vsel %vm6714_vm7, %v5250_v37, %v4289_v9  ;;  %v4293_v44 = vsel %vm6714_vm7, %v4291_v3, %v4292_v48  ;;  %v8365_v24 = vld [vmem:[%s8498_s2] ss:$0 sm:$0xff] }
 0x16b   : > { %5605 = vmatmul.mubr.msk.bf16.gmra.mrb[20].mxu1 %vm715_vm3, %v5053_v15  ;;  %5741 = vmatmul.mubr.msk.bf16.gmra.mrb[20].mxu0 %vm715_vm3, %v5265_v33  ;;  %v2373_v31 = vsel %vm6448_vm4, %v2368_v61, %v8281_v47  ;;  %v4297_v38 = vsel %vm6714_vm7, %v5251_v19, %v4296_v16  ;;  %v4300_v0 = vsel %vm6714_vm7, %v4298_v53, %v4299_v56  ;;  %v2404_v23 = vshll.u32 %v6235_v59, 16 }
 0x16c   : > { %5608 = vmatprep.mubr.msk.bf16.mxu1 %vm715_vm3, %v5054_v43  ;;  %5744 = vmatprep.mubr.msk.bf16.mxu0 %vm715_vm3, %v5266_v30  ;;  %v2383_v6 = vsel %vm6448_vm4, %v2378_v57, %v2382_v21  ;;  %v2391_v63 = vor.u32 %v2390_v28, %v2387_v14  ;;  %v2401_v62 = vor.u32 %v2400_v45, %v2396_v36  ;;  %v4303_v2 = vrot.slane %v6236_v27, 5 }
 0x16d   : > { %v5055_v39 = vcombine.low %v2349_v42, %v2359_v11  ;;  %v5267_v15 = vcombine.low %v4290_v25, %v4293_v44  ;;  %v5056_v33 = vcombine.low %v2373_v31, %v2383_v6  ;;  %v5268_v58 = vcombine.low %v4297_v38, %v4300_v0 }
 0x16e   : > { %v2406_v29 = vrot.slane %v2404_v23, 5  ;;  %v5252_v46 = vrot.slane %v6237_v26, 9  ;;  %v2392_v47 = vrot.slane %v2391_v63, 4  ;;  %v2402_v5 = vrot.slane %v2401_v62, 4 }
 0x16f   : > { %v4305_v51 = vrot.slane %v4303_v2, 4  ;;  %v4306_v41 = vrot.slane %v7873_v20, 5 }
 0x170   : > { %v4304_v13 = vsel %vm6714_vm7, %v5252_v46, %v4303_v2  ;;  %v2397_v49 = vsel %vm6448_vm4, %v2392_v47, %v2396_v36  ;;  %v2407_v35 = vsel %vm6448_vm4, %v2402_v5, %v2406_v29 }
 0x171   : > { %v4307_v20 = vsel %vm6714_vm7, %v4305_v51, %v4306_v41  ;;  %v5057_v37 = vcombine.low %v2397_v49, %v2407_v35 }
 0x172   : > { %v5269_v4 = vcombine.low %v4304_v13, %v4307_v20 }
 0x173   : > { %5609 = vmatmul.mubr.msk.bf16.gmra.mrb[24].mxu1 %vm715_vm3, %v5055_v39  ;;  %5745 = vmatmul.mubr.msk.bf16.gmra.mrb[24].mxu0 %vm715_vm3, %v5267_v15 }
 0x174   : > { %5612 = vmatprep.mubr.msk.bf16.mxu1 %vm715_vm3, %v5056_v33  ;;  %5748 = vmatprep.mubr.msk.bf16.mxu0 %vm715_vm3, %v5268_v58 }
 0x17b   : > { %5613 = vmatmul.mubr.msk.bf16.gmra.mrb[28].mxu1 %vm715_vm3, %v5057_v37  ;;  %5749 = vmatmul.mubr.msk.bf16.gmra.mrb[28].mxu0 %vm715_vm3, %v5269_v4 }
 0x1f6   : > { %v5552_v22 = vpop.f32.mrb[0].mxu1 }
 0x1f7   : > { %v1865_v34 = vpop.f32.mrb[1].mxu1 }
 0x1f8   : > { %v5553_v9 = vpop.f32.mrb[2].mxu1 }
 0x1f9   : > { %v1868_v18 = vpop.f32.mrb[3].mxu1 }
 0x1fe   : > { %v5556_v50 = vpop.f32.mrb[4].mxu1 }
 0x1ff   : > { %v1881_v30 = vpop.f32.mrb[5].mxu1 }
 0x200   : > { %v5557_v10 = vpop.f32.mrb[6].mxu1 }
 0x201   : > { %v1884_v32 = vpop.f32.mrb[7].mxu1 }
 0x206   : > { %v5560_v60 = vpop.f32.mrb[8].mxu1 }
 0x207   : > { %v1897_v16 = vpop.f32.mrb[9].mxu1 }
 0x208   : > { %v5561_v12 = vpop.f32.mrb[10].mxu1 }
 0x209   : > { %v1900_v52 = vpop.f32.mrb[11].mxu1 }
 0x20e   : > { %v8353_v8 = vpop.f32.mrb[12].mxu1 }
 0x20f   : > { %v8355_v7 = vpop.f32.mrb[13].mxu1 }
 0x210   : > { %v8357_v40 = vpop.f32.mrb[14].mxu1 }
 0x211   : > { %v8359_v55 = vpop.f32.mrb[15].mxu1 }
 0x216   : > { %v5722_v43 = vpop.f32.mrb[0].mxu0 }
 0x217   : > { %v5754_v1 = vadd.f32 %v5722_v43, %v5552_v22  ;;  %v4443_v48 = vpop.f32.mrb[1].mxu0 }
 0x218   : > { %v5755_v54 = vadd.f32 %v4443_v48, %v1865_v34  ;;  %v5723_v3 = vpop.f32.mrb[2].mxu0 }
 0x219   : > { %v4611_v21 = vadd.f32 %v5754_v1, %v8365_v24  ;;  %v5756_v17 = vadd.f32 %v5723_v3, %v5553_v9  ;;  %v4446_v19 = vpop.f32.mrb[3].mxu0 }
 0x21a   : > { %v4609_v61 = vadd.f32 %v5755_v54, %v8365_v24  ;;  %v5757_v53 = vadd.f32 %v4446_v19, %v1868_v18 }
 0x21b   : > { %v4643_v56 = vmax.f32 %v4611_v21, 0.0  ;;  %v4612_v14 = vadd.f32 %v5756_v17, %v8365_v24 }
 0x21c   : > { %v4641_v57 = vmax.f32 %v4609_v61, 0.0  ;;  %v4610_v28 = vadd.f32 %v5757_v53, %v8365_v24 }
 0x21d   : > { %4675 = vst [vmem:[%s8373_s19 + $0x10] sm:$0xff] %v4643_v56  ;;  %v4644_v36 = vmax.f32 %v4612_v14, 0.0 }
 0x21e   : > { %4673 = vst [vmem:[%s8373_s19] sm:$0xff] %v4641_v57  ;;  %v4642_v45 = vmax.f32 %v4610_v28, 0.0  ;;  %v5726_v42 = vpop.f32.mrb[4].mxu0 }
 0x21f   : > { %4676 = vst [vmem:[%s8373_s19 + $0x18] sm:$0xff] %v4644_v36  ;;  %v5758_v11 = vadd.f32 %v5726_v42, %v5556_v50  ;;  %v4459_v25 = vpop.f32.mrb[5].mxu0 }
 0x220   : > { %4674 = vst [vmem:[%s8373_s19 + $0x8] sm:$0xff] %v4642_v45  ;;  %v5759_v44 = vadd.f32 %v4459_v25, %v1881_v30  ;;  %v5727_v31 = vpop.f32.mrb[6].mxu0 }
 0x221   : > { %v4615_v38 = vadd.f32 %v5758_v11, %v8365_v24  ;;  %v5760_v0 = vadd.f32 %v5727_v31, %v5557_v10  ;;  %v4462_v59 = vpop.f32.mrb[7].mxu0 }
 0x222   : > { %v4613_v23 = vadd.f32 %v5759_v44, %v8365_v24  ;;  %v5761_v6 = vadd.f32 %v4462_v59, %v1884_v32 }
 0x223   : > { %v4647_v63 = vmax.f32 %v4615_v38, 0.0  ;;  %v4616_v62 = vadd.f32 %v5760_v0, %v8365_v24 }
 0x224   : > { %v4645_v27 = vmax.f32 %v4613_v23, 0.0  ;;  %v4614_v2 = vadd.f32 %v5761_v6, %v8365_v24 }
 0x225   : > { %4679 = vst [vmem:[%s8373_s19 + $0x30] sm:$0xff] %v4647_v63  ;;  %v4648_v39 = vmax.f32 %v4616_v62, 0.0 }
 0x226   : > { %4677 = vst [vmem:[%s8373_s19 + $0x20] sm:$0xff] %v4645_v27  ;;  %v4646_v15 = vmax.f32 %v4614_v2, 0.0  ;;  %v5730_v33 = vpop.f32.mrb[8].mxu0 }
 0x227   : > { %4680 = vst [vmem:[%s8373_s19 + $0x38] sm:$0xff] %v4648_v39  ;;  %v5762_v58 = vadd.f32 %v5730_v33, %v5560_v60  ;;  %v4475_v29 = vpop.f32.mrb[9].mxu0 }
 0x228   : > { %4678 = vst [vmem:[%s8373_s19 + $0x28] sm:$0xff] %v4646_v15  ;;  %v5763_v26 = vadd.f32 %v4475_v29, %v1897_v16  ;;  %v5731_v46 = vpop.f32.mrb[10].mxu0 }
 0x229   : > { %v4619_v47 = vadd.f32 %v5762_v58, %v8365_v24  ;;  %v5764_v5 = vadd.f32 %v5731_v46, %v5561_v12  ;;  %v4478_v51 = vpop.f32.mrb[11].mxu0 }
 0x22a   : > { %v4617_v41 = vadd.f32 %v5763_v26, %v8365_v24  ;;  %v5765_v13 = vadd.f32 %v4478_v51, %v1900_v52 }
 0x22b   : > { %v4651_v49 = vmax.f32 %v4619_v47, 0.0  ;;  %v4620_v35 = vadd.f32 %v5764_v5, %v8365_v24 }
 0x22c   : > { %v4649_v20 = vmax.f32 %v4617_v41, 0.0  ;;  %v4618_v37 = vadd.f32 %v5765_v13, %v8365_v24 }
 0x22d   : > { %4683 = vst [vmem:[%s8373_s19 + $0x50] sm:$0xff] %v4651_v49  ;;  %v4652_v4 = vmax.f32 %v4620_v35, 0.0 }
 0x22e   : > { %4681 = vst [vmem:[%s8373_s19 + $0x40] sm:$0xff] %v4649_v20  ;;  %v4650_v22 = vmax.f32 %v4618_v37, 0.0  ;;  %v5734_v34 = vpop.f32.mrb[12].mxu0 }
 0x22f   : > { %4684 = vst [vmem:[%s8373_s19 + $0x58] sm:$0xff] %v4652_v4  ;;  %v5766_v9 = vadd.f32 %v5734_v34, %v8353_v8  ;;  %v4491_v18 = vpop.f32.mrb[13].mxu0 }
 0x230   : > { %4682 = vst [vmem:[%s8373_s19 + $0x48] sm:$0xff] %v4650_v22  ;;  %v5767_v50 = vadd.f32 %v4491_v18, %v8355_v7  ;;  %v5735_v30 = vpop.f32.mrb[14].mxu0 }
 0x231   : > { %v4623_v10 = vadd.f32 %v5766_v9, %v8365_v24  ;;  %v5768_v32 = vadd.f32 %v5735_v30, %v8357_v40  ;;  %v4494_v60 = vpop.f32.mrb[15].mxu0 }
 0x232   : > { %v4621_v16 = vadd.f32 %v5767_v50, %v8365_v24  ;;  %v5769_v12 = vadd.f32 %v4494_v60, %v8359_v55 }
 0x233   : > { %v4655_v52 = vmax.f32 %v4623_v10, 0.0  ;;  %v4624_v8 = vadd.f32 %v5768_v32, %v8365_v24 }
 0x234   : > { %v4653_v43 = vmax.f32 %v4621_v16, 0.0  ;;  %v4622_v1 = vadd.f32 %v5769_v12, %v8365_v24 }
 0x235   : > { %4687 = vst [vmem:[%s8373_s19 + $0x70] sm:$0xff] %v4655_v52  ;;  %v4656_v7 = vmax.f32 %v4624_v8, 0.0 }
 0x236   : > { %4685 = vst [vmem:[%s8373_s19 + $0x60] sm:$0xff] %v4653_v43  ;;  %v4654_v48 = vmax.f32 %v4622_v1, 0.0  ;;  %v5602_v54 = vpop.f32.mrb[16].mxu1  ;;  %v5738_v3 = vpop.f32.mrb[16].mxu0 }
 0x237   : > { %4688 = vst [vmem:[%s8373_s19 + $0x78] sm:$0xff] %v4656_v7  ;;  %v5770_v40 = vadd.f32 %v5738_v3, %v5602_v54  ;;  %v2607_v21 = vpop.f32.mrb[17].mxu1  ;;  %v4507_v17 = vpop.f32.mrb[17].mxu0 }
 0x238   : > { %4686 = vst [vmem:[%s8373_s19 + $0x68] sm:$0xff] %v4654_v48  ;;  %v5771_v55 = vadd.f32 %v4507_v17, %v2607_v21  ;;  %v5603_v19 = vpop.f32.mrb[18].mxu1  ;;  %v5739_v61 = vpop.f32.mrb[18].mxu0 }
 0x239   : > { %v4627_v53 = vadd.f32 %v5770_v40, %v8365_v24  ;;  %v5772_v56 = vadd.f32 %v5739_v61, %v5603_v19  ;;  %v2610_v14 = vpop.f32.mrb[19].mxu1  ;;  %v4510_v57 = vpop.f32.mrb[19].mxu0 }
 0x23a   : > { %v4625_v28 = vadd.f32 %v5771_v55, %v8365_v24  ;;  %v5773_v36 = vadd.f32 %v4510_v57, %v2610_v14 }
 0x23b   : > { %v4659_v45 = vmax.f32 %v4627_v53, 0.0  ;;  %v4628_v42 = vadd.f32 %v5772_v56, %v8365_v24 }
 0x23c   : > { %v4657_v11 = vmax.f32 %v4625_v28, 0.0  ;;  %v4626_v25 = vadd.f32 %v5773_v36, %v8365_v24 }
 0x23d   : > { %4691 = vst [vmem:[%s8373_s19 + $0x90] sm:$0xff] %v4659_v45  ;;  %v4660_v44 = vmax.f32 %v4628_v42, 0.0 }
 0x23e   : > { %4689 = vst [vmem:[%s8373_s19 + $0x80] sm:$0xff] %v4657_v11  ;;  %v4658_v31 = vmax.f32 %v4626_v25, 0.0  ;;  %v5606_v38 = vpop.f32.mrb[20].mxu1  ;;  %v5742_v0 = vpop.f32.mrb[20].mxu0 }
 0x23f   : > { %4692 = vst [vmem:[%s8373_s19 + $0x98] sm:$0xff] %v4660_v44  ;;  %v5774_v59 = vadd.f32 %v5742_v0, %v5606_v38  ;;  %v2623_v23 = vpop.f32.mrb[21].mxu1  ;;  %v4523_v6 = vpop.f32.mrb[21].mxu0 }
 0x240   : > { %4690 = vst [vmem:[%s8373_s19 + $0x88] sm:$0xff] %v4658_v31  ;;  %v5775_v63 = vadd.f32 %v4523_v6, %v2623_v23  ;;  %v5607_v62 = vpop.f32.mrb[22].mxu1  ;;  %v5743_v27 = vpop.f32.mrb[22].mxu0 }
 0x241   : > { %v4631_v2 = vadd.f32 %v5774_v59, %v8365_v24  ;;  %v5776_v39 = vadd.f32 %v5743_v27, %v5607_v62  ;;  %v2626_v15 = vpop.f32.mrb[23].mxu1  ;;  %v4526_v33 = vpop.f32.mrb[23].mxu0 }
 0x242   : > { %v4629_v58 = vadd.f32 %v5775_v63, %v8365_v24  ;;  %v5777_v29 = vadd.f32 %v4526_v33, %v2626_v15 }
 0x243   : > { %v4663_v26 = vmax.f32 %v4631_v2, 0.0  ;;  %v4632_v46 = vadd.f32 %v5776_v39, %v8365_v24 }
 0x244   : > { %v4661_v47 = vmax.f32 %v4629_v58, 0.0  ;;  %v4630_v5 = vadd.f32 %v5777_v29, %v8365_v24 }
 0x245   : > { %4695 = vst [vmem:[%s8373_s19 + $0xb0] sm:$0xff] %v4663_v26  ;;  %v4664_v51 = vmax.f32 %v4632_v46, 0.0 }
 0x246   : > { %4693 = vst [vmem:[%s8373_s19 + $0xa0] sm:$0xff] %v4661_v47  ;;  %v4662_v41 = vmax.f32 %v4630_v5, 0.0  ;;  %v5610_v13 = vpop.f32.mrb[24].mxu1  ;;  %v5746_v49 = vpop.f32.mrb[24].mxu0 }
 0x247   : > { %4696 = vst [vmem:[%s8373_s19 + $0xb8] sm:$0xff] %v4664_v51  ;;  %v5778_v35 = vadd.f32 %v5746_v49, %v5610_v13  ;;  %v2639_v20 = vpop.f32.mrb[25].mxu1  ;;  %v4539_v37 = vpop.f32.mrb[25].mxu0 }
 0x248   : > { %4694 = vst [vmem:[%s8373_s19 + $0xa8] sm:$0xff] %v4662_v41  ;;  %v5779_v4 = vadd.f32 %v4539_v37, %v2639_v20  ;;  %v5611_v22 = vpop.f32.mrb[26].mxu1  ;;  %v5747_v34 = vpop.f32.mrb[26].mxu0 }
 0x249   : > { %v4635_v9 = vadd.f32 %v5778_v35, %v8365_v24  ;;  %v5780_v18 = vadd.f32 %v5747_v34, %v5611_v22  ;;  %v2642_v50 = vpop.f32.mrb[27].mxu1  ;;  %v4542_v30 = vpop.f32.mrb[27].mxu0 }
 0x24a   : > { %v4633_v10 = vadd.f32 %v5779_v4, %v8365_v24  ;;  %v5781_v32 = vadd.f32 %v4542_v30, %v2642_v50 }
 0x24b   : > { %v4667_v60 = vmax.f32 %v4635_v9, 0.0  ;;  %v4636_v16 = vadd.f32 %v5780_v18, %v8365_v24 }
 0x24c   : > { %v4665_v12 = vmax.f32 %v4633_v10, 0.0  ;;  %v4634_v52 = vadd.f32 %v5781_v32, %v8365_v24 }
 0x24d   : > { %4699 = vst [vmem:[%s8373_s19 + $0xd0] sm:$0xff] %v4667_v60  ;;  %v4668_v8 = vmax.f32 %v4636_v16, 0.0 }
 0x24e   : > { %4697 = vst [vmem:[%s8373_s19 + $0xc0] sm:$0xff] %v4665_v12  ;;  %v4666_v43 = vmax.f32 %v4634_v52, 0.0  ;;  %v5614_v1 = vpop.f32.mrb[28].mxu1  ;;  %v5750_v7 = vpop.f32.mrb[28].mxu0 }
 0x24f   : > { %4700 = vst [vmem:[%s8373_s19 + $0xd8] sm:$0xff] %v4668_v8  ;;  %v5782_v48 = vadd.f32 %v5750_v7, %v5614_v1  ;;  %v2655_v54 = vpop.f32.mrb[29].mxu1  ;;  %v4555_v3 = vpop.f32.mrb[29].mxu0 }
 0x250   : > { %4698 = vst [vmem:[%s8373_s19 + $0xc8] sm:$0xff] %v4666_v43  ;;  %v5783_v40 = vadd.f32 %v4555_v3, %v2655_v54  ;;  %v5615_v21 = vpop.f32.mrb[30].mxu1  ;;  %v5751_v17 = vpop.f32.mrb[30].mxu0 }
 0x251   : > { %v4639_v55 = vadd.f32 %v5782_v48, %v8365_v24  ;;  %v5784_v19 = vadd.f32 %v5751_v17, %v5615_v21  ;;  %v2658_v61 = vpop.f32.mrb[31].mxu1  ;;  %v4558_v53 = vpop.f32.mrb[31].mxu0 }
 0x252   : > { %v4637_v56 = vadd.f32 %v5783_v40, %v8365_v24  ;;  %v5785_v14 = vadd.f32 %v4558_v53, %v2658_v61 }
 0x253   : > { %v4671_v57 = vmax.f32 %v4639_v55, 0.0  ;;  %v4640_v28 = vadd.f32 %v5784_v19, %v8365_v24 }
 0x254   : > { %v4669_v36 = vmax.f32 %v4637_v56, 0.0  ;;  %v4638_v45 = vadd.f32 %v5785_v14, %v8365_v24 }
 0x255   : > { %4703 = vst [vmem:[%s8373_s19 + $0xf0] sm:$0xff] %v4671_v57  ;;  %v4672_v42 = vmax.f32 %v4640_v28, 0.0 }
 0x256   : > { %4701 = vst [vmem:[%s8373_s19 + $0xe0] sm:$0xff] %v4669_v36  ;;  %v4670_v11 = vmax.f32 %v4638_v45, 0.0 }
 0x257   : > { %4704 = vst [vmem:[%s8373_s19 + $0xf8] sm:$0xff] %v4672_v42 }
 0x258   : > { %4702 = vst [vmem:[%s8373_s19 + $0xe8] sm:$0xff] %v4670_v11 }
 0x259   : > { %6251 = shalt.err (!%p6248_p5)
}
 0x25a   : > { %s6252_s6 = scalar_lea.hbm %s8441_s28, 4096  ;;  %s6256_s9 = scalar_lea.hbm %s8499_s3, 8192 }
 0x25b   : > { %p6253_p6 = scmp.ne.s32.totalorder %s8441_s28, %s6252_s6  ;;  %p6257_p10 = scmp.lt.u32.totalorder %s8441_s28, %s8499_s3 }
 0x25c   : > { %p6258_p11 = scmp.lt.u32.totalorder %s6256_s9, %s6252_s6  ;;  %p6260_p13 = scmp.lt.u32.totalorder %s6252_s6, %s8441_s28 }
 0x25d   : > { %p6254_p7 = pnand %p6253_p6, %p6381_p4 }
 0x25e   : > { %p6259_p12 = por %p6258_p11, %p6257_p10 }
 0x25f   : > { %p6255_p9 = pneg %p6254_p7 }
 0x260   : > { %p6261_p0 = por %p6260_p13, %p6259_p12 }
 0x262   : > { %p6262_p1 = pnand %p6261_p0, %p6255_p9 }
 0x264   : > { %6265 = shalt.err (!%p6262_p1)
}
 0x265   : > { %s6319_s18 = smov 128   ;;  %s6320_s19 = smov 8  }
 0x266   : > { %6021 = dma.vmem_to_hbm [thread:$0]  (%p6381_p4), %s8443_s23, 4096, %s8441_s28, %s8450_s15, %s6319_s18, %s6319_s18, %s6320_s19  }
 0x267 PF: > { %p6027_p2 = scmp.ge.s32.totalorder %s6316_s17, 2  ;;  %s4738_s21 = sand.u32 1, %s6296_s12  }
 0x268   : > { %s4739_s26 = scalar_lea.sflag [#allocation3], %s4738_s21 }
 0x269   : > { %p6024_p3 = pnand %p6027_p2, %p6388_p8 }
 0x26b   : > { %6291 = dma.done.wait (!%p6024_p3), %s4739_s26, 4096  }
 0x26c   : > { %6293 = vsyncadd (!%p6024_p3), %s4739_s26, 4294963200  ;;  %s16_s17 = sadd.s32 1, %s6316_s17   ;;  %s8614_s12 = smov %s6300_s13 }
 0x26d   : > { %p13_p5 = scmp.ge.s32.totalorder %s16_s17, 4   ;;  %s8615_s13 = smov %s6304_s14 }
 0x26e   : > { %s8616_s14 = smov %s6394_s25  ;;  %s8617_s15 = smov %s6312_s16 }
 0x26f   : > { %s8618_s16 = smov %s8620_s20  ;;  %15 = sbr.rel (!%p13_p5) target bundleno = 4 (0x4), region = 84 }
 0x276   :  { %4744 = vsyncpa [#allocation3], 1 }
 0x277   :  { %4746 = vsyncpa [#allocation3 + $0x1], 1 }

</bundles_post_ra>
